<compile_context>
chip_gen: v7x
topology: tpu7x:2x2x1
jax: 0.10.0
libtpu: 0.0.40
codegen_flags: <defaults>
</compile_context>

<pallas_src>
import functools

import jax
import jax.numpy as jnp
from jax import lax
from jax.experimental import pallas as pl
from jax.experimental.pallas import tpu as pltpu


def _round_up(x, m):
    return (x + m - 1) // m * m


def _largest_divisor(n, granule, cap):
    """Largest d <= cap with d % granule == 0 and n % d == 0 (n % granule == 0)."""
    cap = min(cap, n)
    cap = (cap // granule) * granule
    d = cap
    while d >= granule:
        if n % d == 0:
            return d
        d -= granule
    return granule


@functools.lru_cache(maxsize=1)
def _vmem_budget_bytes():
    """Generation-aware VMEM working-set budget for the kernels."""
    cap = 64 * 2**20
    try:
        info = pltpu.get_tpu_info()
        cap = int(getattr(info, "vmem_capacity_bytes", cap))
    except Exception:
        pass
    if cap <= 64 * 2**20:                    # v7x-class core: leave XLA headroom
        return int(0.60 * cap)
    return int(min(0.75 * cap, 96 * 2**20))  # 128 MiB parts (v5e / v6e)


# ----------------------------------------------------------------------------
# Fused matmul kernel:  out = relu?( A @ W + b  [ + R @ Wr + br ] )
# Grid = (M tiles [parallel], N tiles [parallel], K tiles [arbitrary, acc]).
# ----------------------------------------------------------------------------
def _make_matmul_kernel(do_relu: bool, fuse_residual: bool):
    if fuse_residual:
        def kernel(a_ref, w_ref, b_ref, r_ref, wr_ref, br_ref, o_ref, acc_ref):
            k = pl.program_id(2)

            @pl.when(k == 0)
            def _():
                # Projection shortcut + both biases initialize the accumulator,
                # keeping the last-K epilogue to relu + cast + store.
                acc_ref[...] = (
                    jnp.dot(r_ref[...], wr_ref[...],
                            preferred_element_type=jnp.float32)
                    + br_ref[...] + b_ref[...])

            acc_ref[...] += jnp.dot(a_ref[...], w_ref[...],
                                    preferred_element_type=jnp.float32)

            @pl.when(k == pl.num_programs(2) - 1)
            def _():
                acc = acc_ref[...]
                if do_relu:
                    acc = jnp.maximum(acc, 0.0)
                o_ref[...] = acc.astype(o_ref.dtype)
        return kernel

    def kernel(a_ref, w_ref, b_ref, o_ref, acc_ref):
        k = pl.program_id(2)

        @pl.when(k == 0)
        def _():
            acc_ref[...] = jnp.broadcast_to(b_ref[...], acc_ref.shape
                                            ).astype(jnp.float32)

        acc_ref[...] += jnp.dot(a_ref[...], w_ref[...],
                                preferred_element_type=jnp.float32)

        @pl.when(k == pl.num_programs(2) - 1)
        def _():
            acc = acc_ref[...]
            if do_relu:
                acc = jnp.maximum(acc, 0.0)
            o_ref[...] = acc.astype(o_ref.dtype)
    return kernel


def fused_conv_bn(a, w, bias, *, residual=None, w_res=None, bias_res=None,
                  do_relu=True, out_dtype=jnp.bfloat16):
    """out = relu?(a @ w + bias [+ residual @ w_res + bias_res]).

    a: (M, K), w: (K, N), bias: (N,); BN scale pre-folded into w / w_res.
    """
    M, K = a.shape
    Kw, Nc = w.shape
    assert K == Kw, (K, Kw)
    fuse_residual = residual is not None

    a = a.astype(jnp.bfloat16)
    w = w.astype(jnp.bfloat16)
    bias = bias.reshape(1, Nc).astype(jnp.float32)
    if fuse_residual:
        residual = residual.astype(jnp.bfloat16)
        w_res = w_res.astype(jnp.bfloat16)
        bias_res = bias_res.reshape(1, Nc).astype(jnp.float32)
        K2 = residual.shape[1]
    else:
        K2 = 0

    out_isz = jnp.dtype(out_dtype).itemsize
    budget = _vmem_budget_bytes()

    def usage(tm_, tk_, tn_):
        u = 2 * tm_ * tk_ * 2            # A tiles (bf16, double-buffered)
        u += 2 * tk_ * tn_ * 2           # W tiles
        u += 2 * tn_ * 4                 # bias
        u += tm_ * tn_ * 4               # f32 accumulator scratch
        u += 2 * tm_ * tn_ * out_isz     # output tiles
        if fuse_residual:
            u += 2 * tm_ * K2 * 2 + 2 * K2 * tn_ * 2 + 2 * tn_ * 4
        return u

    # ---- M tiling: divisor-based (no pad copy when M % 16 == 0); ensure >= 2
    #      tiles so both TensorCores get work on v7x. ----
    M16 = _round_up(M, 16)
    tm_cap = 512
    if M16 >= 32:
        tm_cap = min(tm_cap, max(16, (M16 // 2) // 16 * 16))
    tm = _largest_divisor(M16, 16, tm_cap)

    # ---- N tiling: lane-dense multiples of 128. ----
    tn = _largest_divisor(Nc, 128, 512) if Nc % 128 == 0 else Nc

    # ---- K tiling: keep the whole K resident unless VMEM budget says no. ----
    tk = K
    if K % 128 == 0:
        while usage(tm, tk, tn) > budget and tk > 128:
            tk = _largest_divisor(K, 128, tk - 128)
    while usage(tm, tk, tn) > budget and Nc % 128 == 0 and tn > 128:
        tn = _largest_divisor(Nc, 128, tn - 128)
    while usage(tm, tk, tn) > budget and tm > 16:
        tm = _largest_divisor(M16, 16, tm - 16)

    M_pad = M16
    if M_pad != M:
        a = jnp.pad(a, ((0, M_pad - M), (0, 0)))
        if fuse_residual:
            residual = jnp.pad(residual, ((0, M_pad - M), (0, 0)))

    grid = (M_pad // tm, Nc // tn, K // tk)
    kernel = _make_matmul_kernel(do_relu, fuse_residual)

    in_specs = [
        pl.BlockSpec((tm, tk), lambda i, j, k: (i, k)),     # A tile
        pl.BlockSpec((tk, tn), lambda i, j, k: (k, j)),     # W tile
        pl.BlockSpec((1, tn), lambda i, j, k: (0, j)),      # folded-BN bias
    ]
    args = [a, w, bias]
    if fuse_residual:
        in_specs += [
            pl.BlockSpec((tm, K2), lambda i, j, k: (i, 0)),  # residual input
            pl.BlockSpec((K2, tn), lambda i, j, k: (0, j)),  # residual weight
            pl.BlockSpec((1, tn), lambda i, j, k: (0, j)),   # residual bias
        ]
        args += [residual, w_res, bias_res]

    flops = 2 * M * K * Nc + (2 * M * K2 * Nc if fuse_residual else 0)
    bytes_accessed = (a.size + w.size) * 2 + bias.size * 4 + M_pad * Nc * out_isz
    if fuse_residual:
        bytes_accessed += (residual.size + w_res.size) * 2 + bias_res.size * 4

    out = pl.pallas_call(
        kernel,
        out_shape=jax.ShapeDtypeStruct((M_pad, Nc), out_dtype),
        grid=grid,
        in_specs=in_specs,
        out_specs=pl.BlockSpec((tm, tn), lambda i, j, k: (i, j)),
        scratch_shapes=[pltpu.VMEM((tm, tn), jnp.float32)],
        compiler_params=pltpu.CompilerParams(
            dimension_semantics=("parallel", "parallel", "arbitrary"),
            vmem_limit_bytes=int(budget)),
        cost_estimate=pl.CostEstimate(flops=int(flops), transcendentals=0,
                                      bytes_accessed=int(bytes_accessed)),
    )(*args)

    return out[:M] if M_pad != M else out


# ----------------------------------------------------------------------------
# Fused conv2: 3x3 conv (pad=1, stride s) + folded-BN bias + ReLU.
# The 9 taps are accumulated in-kernel from a space-to-depth view of the
# padded input, so the 9x im2col tensor never hits HBM.
# ----------------------------------------------------------------------------
def conv2_3x3_bn_relu(out1_img, w2_taps, b2, stride):
    N, H, W, C = out1_img.shape
    s = int(stride)
    Ho = (H - 1) // s + 1
    Wo = (W - 1) // s + 1

    Hp = _round_up(H + 2, s)                 # conv zero-pad of 1, rounded to s
    Wp = _round_up(W + 2, s)
    Hq, Wq = Hp // s, Wp // s                # parity-plane spatial dims
    ai_max = 2 // s                          # max quotient row/col offset of a tap
    aj_max = 2 // s
    Wq_e = Wq + aj_max                       # extra zero cols -> contiguous flat taps
    Hq_e = max(Hq, Ho + ai_max + 1)
    Lq = Hq_e * Wq_e
    Mo_e = Ho * Wq_e                         # rows computed per image (extra cols dropped)

    x = out1_img.astype(jnp.bfloat16)
    xp = jnp.pad(x, ((0, 0), (1, Hp - H - 1), (1, Wp - W - 1), (0, 0)))
    planes = xp.reshape(N, Hq, s, Wq, s, C).transpose(0, 2, 4, 1, 3, 5)
    planes = jnp.pad(planes, ((0, 0), (0, 0), (0, 0),
                              (0, Hq_e - Hq), (0, Wq_e - Wq), (0, 0)))
    planes = planes.reshape(N, s * s, Lq, C)

    w2_taps = w2_taps.astype(jnp.bfloat16)   # (9, C, C), BN scale folded in
    b2 = b2.reshape(1, C).astype(jnp.float32)

    def kernel(x_ref, w_ref, b_ref, o_ref, acc_ref):
        first = True
        for di in range(3):
            for dj in range(3):
                p = (di % s) * s + (dj % s)
                off = (di // s) * Wq_e + (dj // s)
                plane = x_ref[0, p]                       # (Lq, C) bf16
                a = plane[off:off + Mo_e, :]              # contiguous 2-D slice
                contrib = jnp.dot(a, w_ref[di * 3 + dj],
                                  preferred_element_type=jnp.float32)
                if first:
                    acc_ref[...] = contrib
                    first = False
                else:
                    acc_ref[...] += contrib
        o_ref[0] = jnp.maximum(acc_ref[...] + b_ref[...], 0.0).astype(o_ref.dtype)

    out = pl.pallas_call(
        kernel,
        out_shape=jax.ShapeDtypeStruct((N, Mo_e, C), jnp.bfloat16),
        grid=(N,),
        in_specs=[
            pl.BlockSpec((1, s * s, Lq, C), lambda n: (n, 0, 0, 0)),
            pl.BlockSpec((9, C, C), lambda n: (0, 0, 0)),
            pl.BlockSpec((1, C), lambda n: (0, 0)),
        ],
        out_specs=pl.BlockSpec((1, Mo_e, C), lambda n: (n, 0, 0)),
        scratch_shapes=[pltpu.VMEM((Mo_e, C), jnp.float32)],
        compiler_params=pltpu.CompilerParams(
            dimension_semantics=("parallel",),
            vmem_limit_bytes=int(_vmem_budget_bytes())),
        cost_estimate=pl.CostEstimate(
            flops=int(2 * 9 * N * Mo_e * C * C),
            transcendentals=0,
            bytes_accessed=int(planes.size * 2 + w2_taps.size * 2
                               + b2.size * 4 + N * Mo_e * C * 2)),
    )(planes, w2_taps, b2)

    return out.reshape(N, Ho, Wq_e, C)[:, :, :Wo, :]


# ----------------------------------------------------------------------------
# Parameters: raw (PyTorch-style) + folded/padded/bf16 matmul form
# ----------------------------------------------------------------------------
def _fold_bn(gamma, beta, mean, var, eps=1e-5):
    scale = gamma / jnp.sqrt(var + eps)
    bias = beta - mean * scale
    return scale, bias


def _pad2(w, rows, cols):
    r, c = w.shape
    return jnp.pad(w, ((0, rows - r), (0, cols - c)))


def _pad1(v, n):
    return jnp.pad(v, (0, n - v.shape[0]))


def init_raw_params(key, in_planes, mid_planes, out_planes):
    ks = jax.random.split(key, 8)

    def w(k, shape):            # conv weights, OIHW like PyTorch
        return 0.1 * jax.random.normal(k, shape, jnp.float32)

    def bn(k, c):
        k1, k2, k3, k4 = jax.random.split(k, 4)
        gamma = 1.0 + 0.1 * jax.random.normal(k1, (c,), jnp.float32)
        beta = 0.1 * jax.random.normal(k2, (c,), jnp.float32)
        mean = 0.1 * jax.random.normal(k3, (c,), jnp.float32)
        var = 0.5 + 0.5 * jnp.abs(jax.random.normal(k4, (c,), jnp.float32))
        return gamma, beta, mean, var

    return {
        "W0": w(ks[0], (out_planes, in_planes, 1, 1)),
        "W1": w(ks[1], (mid_planes, in_planes, 1, 1)),
        "W2": w(ks[2], (mid_planes, mid_planes, 3, 3)),
        "W3": w(ks[3], (out_planes, mid_planes, 1, 1)),
        "bn0": bn(ks[4], out_planes),
        "bn1": bn(ks[5], mid_planes),
        "bn2": bn(ks[6], mid_planes),
        "bn3": bn(ks[7], out_planes),
    }


def prepare_params(raw, in_planes, mid_planes, out_planes):
    """Fold BN scale into weights, pad channels to multiples of 128, cast bf16."""
    cin_p = _round_up(in_planes, 128)
    cmid_p = _round_up(mid_planes, 128)
    cout_p = _round_up(out_planes, 128)

    s0, b0 = _fold_bn(*raw["bn0"])
    s1, b1 = _fold_bn(*raw["bn1"])
    s2, b2 = _fold_bn(*raw["bn2"])
    s3, b3 = _fold_bn(*raw["bn3"])

    w0 = raw["W0"][:, :, 0, 0].T * s0[None, :]
    w1 = raw["W1"][:, :, 0, 0].T * s1[None, :]
    w3 = raw["W3"][:, :, 0, 0].T * s3[None, :]

    # 3x3 conv -> (9, Cmid_p, Cmid_p), tap order (kh*3+kw), BN scale folded.
    w2_khwio = jnp.transpose(raw["W2"], (2, 3, 1, 0)) * s2[None, None, None, :]
    w2_p = jnp.zeros((3, 3, cmid_p, cmid_p), jnp.float32)
    w2_p = w2_p.at[:, :, :mid_planes, :mid_planes].set(w2_khwio)
    w2_p = w2_p.reshape(9, cmid_p, cmid_p)

    return {
        "w0": _pad2(w0, cin_p, cout_p).astype(jnp.bfloat16),
        "w1": _pad2(w1, cin_p, cmid_p).astype(jnp.bfloat16),
        "w2": w2_p.astype(jnp.bfloat16),
        "w3": _pad2(w3, cmid_p, cout_p).astype(jnp.bfloat16),
        "b0": _pad1(b0, cout_p).astype(jnp.float32),
        "b1": _pad1(b1, cmid_p).astype(jnp.float32),
        "b2": _pad1(b2, cmid_p).astype(jnp.float32),
        "b3": _pad1(b3, cout_p).astype(jnp.float32),
    }


# ----------------------------------------------------------------------------
# Bottle_top forward using the fused Pallas kernels
# ----------------------------------------------------------------------------
@functools.partial(jax.jit, static_argnums=(2, 3))
def bottle_top_pallas(x_nchw, params, stride, out_planes):
    x = jnp.transpose(x_nchw, (0, 2, 3, 1))               # NHWC
    N, H, W, Cin = x.shape
    cin_p = params["w1"].shape[0]
    cmid_p = params["w1"].shape[1]
    cout_p = params["w3"].shape[1]

    x = jnp.pad(x, ((0, 0), (0, 0), (0, 0), (0, cin_p - Cin))).astype(jnp.bfloat16)

    # strided 1x1 conv == spatial subsample then channel matmul
    x_s = x[:, ::stride, ::stride, :]
    Ho, Wo = x_s.shape[1], x_s.shape[2]
    M_out = N * Ho * Wo

    # conv1 (1x1) + bn1 + relu
    out1 = fused_conv_bn(x.reshape(N * H * W, cin_p), params["w1"], params["b1"],
                         do_relu=True, out_dtype=jnp.bfloat16)
    out1 = out1.reshape(N, H, W, cmid_p)

    # conv2 (3x3, stride, pad=1) + bn2 + relu, 9 taps fused in-kernel
    out2 = conv2_3x3_bn_relu(out1, params["w2"], params["b2"], stride)

    # conv3 (1x1) + bn3, fused with projection shortcut conv0(1x1,stride)+bn0,
    # the residual add and the final ReLU -- single kernel, single HBM write.
    out3 = fused_conv_bn(out2.reshape(M_out, cmid_p), params["w3"], params["b3"],
                         residual=x_s.reshape(M_out, cin_p),
                         w_res=params["w0"], bias_res=params["b0"],
                         do_relu=True, out_dtype=jnp.bfloat16)

    out = out3.reshape(N, Ho, Wo, cout_p)[..., :out_planes]
    # TODO(synk): keep NHWC/bf16 and let the consumer fuse this transpose+cast.
    return jnp.transpose(out, (0, 3, 1, 2)).astype(jnp.float32)


# ----------------------------------------------------------------------------
# Pure-JAX f32 reference (lax.conv) for a correctness check
# ----------------------------------------------------------------------------
def bottle_top_ref(x, raw, stride, eps=1e-5):
    dn = ("NCHW", "OIHW", "NCHW")

    def conv(x, w, s, pad):
        return lax.conv_general_dilated(x, w, (s, s), pad, dimension_numbers=dn)

    def bn(x, p):
        g, b, m, v = p
        return (g[None, :, None, None] * (x - m[None, :, None, None])
                / jnp.sqrt(v[None, :, None, None] + eps)
                + b[None, :, None, None])

    relu = lambda t: jnp.maximum(t, 0.0)

    residual = bn(conv(x, raw["W0"], stride, "VALID"), raw["bn0"])
    out = relu(bn(conv(x, raw["W1"], 1, "VALID"), raw["bn1"]))
    out = relu(bn(conv(out, raw["W2"], stride, [(1, 1), (1, 1)]), raw["bn2"]))
    out = bn(conv(out, raw["W3"], 1, "VALID"), raw["bn3"])
    return relu(out + residual)


if __name__ == "__main__":
    key = jax.random.PRNGKey(0)
    kx, kp = jax.random.split(key)

    batch, in_planes, mid_planes, out_planes = 2, 8, 8, 16
    H = W = 16
    stride = 2

    x = jax.random.normal(kx, (batch, in_planes, H, W), jnp.float32)
    raw = init_raw_params(kp, in_planes, mid_planes, out_planes)
    params = prepare_params(raw, in_planes, mid_planes, out_planes)

    out = bottle_top_pallas(x, params, stride, out_planes)
    out = jax.block_until_ready(out)

    ref = bottle_top_ref(x, raw, stride)
    assert out.shape == ref.shape == (batch, out_planes, H // stride, W // stride)
    # bf16 MXU path: compare with a loose relative tolerance vs the f32 reference
    rel_err = float(jnp.max(jnp.abs(out - ref)) / (jnp.max(jnp.abs(ref)) + 1e-6))
    assert rel_err < 0.08, rel_err

    print("KERNEL_OK")
</pallas_src>

<mosaic_0001>
module attributes {stable_mosaic.version = 11 : i64} {
  func.func @kernel(%arg0: i32, %arg1: i32, %arg2: i32, %arg3: memref<256x128xbf16, #tpu.memory_space<vmem>>, %arg4: memref<128x128xbf16, #tpu.memory_space<vmem>>, %arg5: memref<1x128xf32, #tpu.memory_space<vmem>>, %arg6: memref<256x128xbf16, #tpu.memory_space<vmem>>, %arg7: memref<256x128xf32, #tpu.memory_space<vmem>>) attributes {dimension_semantics = [#tpu.dimension_semantics<parallel>, #tpu.dimension_semantics<parallel>, #tpu.dimension_semantics<arbitrary>], iteration_bounds = array<i64: 2, 1, 1>, scalar_prefetch = 0 : i64, scratch_operands = 1 : i64, tpu.core_type = #tpu.core_type<tc>, window_params = [{transform_indices = @transform_0, window_bounds = array<i64: 256, 128>}, {transform_indices = @transform_1, window_bounds = array<i64: 128, 128>}, {transform_indices = @transform_2, window_bounds = array<i64: 1, 128>}, {transform_indices = @transform_3, window_bounds = array<i64: 256, 128>}]} {
    %c0_i32 = arith.constant 0 : i32
    %0 = arith.cmpi eq, %arg2, %c0_i32 : i32
    %1 = arith.extui %0 : i1 to i32
    %c0_i32_0 = arith.constant 0 : i32
    %2 = arith.cmpi ne, %1, %c0_i32_0 : i32
    scf.if %2 {
      %c0_10 = arith.constant 0 : index
      %c0_11 = arith.constant 0 : index
      %12 = vector.load %arg5[%c0_10, %c0_11] : memref<1x128xf32, #tpu.memory_space<vmem>>, vector<1x128xf32>
      %13 = vector.shape_cast %12 : vector<1x128xf32> to vector<1x128xf32>
      %14 = vector.broadcast %13 : vector<1x128xf32> to vector<256x128xf32>
      %c0_12 = arith.constant 0 : index
      %c0_13 = arith.constant 0 : index
      %15 = vector.load %arg7[%c0_12, %c0_13] : memref<256x128xf32, #tpu.memory_space<vmem>>, vector<256x128xf32>
      tpu.vector_store %arg7[%c0_12, %c0_13], %14 {strides = array<i32>} : memref<256x128xf32, #tpu.memory_space<vmem>>, vector<256x128xf32>,
    } else {
    }
    %c0 = arith.constant 0 : index
    %c0_1 = arith.constant 0 : index
    %3 = vector.load %arg7[%c0, %c0_1] : memref<256x128xf32, #tpu.memory_space<vmem>>, vector<256x128xf32>
    %c0_2 = arith.constant 0 : index
    %c0_3 = arith.constant 0 : index
    %4 = vector.load %arg3[%c0_2, %c0_3] : memref<256x128xbf16, #tpu.memory_space<vmem>>, vector<256x128xbf16>
    %c0_4 = arith.constant 0 : index
    %c0_5 = arith.constant 0 : index
    %5 = vector.load %arg4[%c0_4, %c0_5] : memref<128x128xbf16, #tpu.memory_space<vmem>>, vector<128x128xbf16>
    %cst = arith.constant dense<0.000000e+00> : vector<256x128xf32>
    %6 = tpu.matmul %4, %5, %cst {dimension_numbers = #tpu.dot_dimension_numbers<[1], [0], [0], [1], [0, 0, 1, 1], [], []>} : vector<256x128xbf16>, vector<128x128xbf16>, vector<256x128xf32> -> vector<256x128xf32>
    %7 = arith.addf %3, %6 : vector<256x128xf32>
    %c0_6 = arith.constant 0 : index
    %c0_7 = arith.constant 0 : index
    %8 = vector.load %arg7[%c0_6, %c0_7] : memref<256x128xf32, #tpu.memory_space<vmem>>, vector<256x128xf32>
    tpu.vector_store %arg7[%c0_6, %c0_7], %7 {strides = array<i32>} : memref<256x128xf32, #tpu.memory_space<vmem>>, vector<256x128xf32>,
    %c0_i32_8 = arith.constant 0 : i32
    %9 = arith.cmpi eq, %arg2, %c0_i32_8 : i32
    %10 = arith.extui %9 : i1 to i32
    %c0_i32_9 = arith.constant 0 : i32
    %11 = arith.cmpi ne, %10, %c0_i32_9 : i32
    scf.if %11 {
      %c0_10 = arith.constant 0 : index
      %c0_11 = arith.constant 0 : index
      %12 = vector.load %arg7[%c0_10, %c0_11] : memref<256x128xf32, #tpu.memory_space<vmem>>, vector<256x128xf32>
      %cst_12 = arith.constant 0.000000e+00 : f32
      %13 = vector.broadcast %cst_12 : f32 to vector<256x128xf32>
      %14 = arith.maximumf %12, %13 : vector<256x128xf32>
      %15 = arith.truncf %14 : vector<256x128xf32> to vector<256x128xbf16>
      %c0_13 = arith.constant 0 : index
      %c0_14 = arith.constant 0 : index
      %16 = vector.load %arg6[%c0_13, %c0_14] : memref<256x128xbf16, #tpu.memory_space<vmem>>, vector<256x128xbf16>
      tpu.vector_store %arg6[%c0_13, %c0_14], %15 {strides = array<i32>} : memref<256x128xbf16, #tpu.memory_space<vmem>>, vector<256x128xbf16>,
    } else {
    }
    return
  }
  func.func @transform_0(%arg0: i32, %arg1: i32, %arg2: i32) -> (i32, i32) {
    %c0_i32 = arith.constant 0 : i32
    return %arg0, %arg2 : i32, i32
  }
  func.func @transform_1(%arg0: i32, %arg1: i32, %arg2: i32) -> (i32, i32) {
    %c0_i32 = arith.constant 0 : i32
    return %arg2, %arg1 : i32, i32
  }
  func.func @transform_2(%arg0: i32, %arg1: i32, %arg2: i32) -> (i32, i32) {
    %c0_i32 = arith.constant 0 : i32
    %c0_i32_0 = arith.constant 0 : i32
    return %c0_i32, %arg1 : i32, i32
  }
  func.func @transform_3(%arg0: i32, %arg1: i32, %arg2: i32) -> (i32, i32) {
    %c0_i32 = arith.constant 0 : i32
    return %arg0, %arg1 : i32, i32
  }
}

module attributes {stable_mosaic.version = 11 : i64} {
  func.func @kernel(%arg0: i32, %arg1: memref<1x4x100x128xbf16, #tpu.memory_space<vmem>>, %arg2: memref<9x128x128xbf16, #tpu.memory_space<vmem>>, %arg3: memref<1x128xf32, #tpu.memory_space<vmem>>, %arg4: memref<1x80x128xbf16, #tpu.memory_space<vmem>>, %arg5: memref<80x128xf32, #tpu.memory_space<vmem>>) attributes {dimension_semantics = [#tpu.dimension_semantics<parallel>], iteration_bounds = array<i64: 2>, scalar_prefetch = 0 : i64, scratch_operands = 1 : i64, tpu.core_type = #tpu.core_type<tc>, window_params = [{transform_indices = @transform_0, window_bounds = array<i64: 1, 4, 100, 128>}, {pipeline_mode = #tpu.pipeline_mode<synchronous>, transform_indices = @transform_1, window_bounds = array<i64: 9, 128, 128>}, {pipeline_mode = #tpu.pipeline_mode<synchronous>, transform_indices = @transform_2, window_bounds = array<i64: 1, 128>}, {transform_indices = @transform_3, window_bounds = array<i64: 1, 80, 128>}]} {
    %c0 = arith.constant 0 : index
    %c0_0 = arith.constant 0 : index
    %c0_1 = arith.constant 0 : index
    %c0_2 = arith.constant 0 : index
    %0 = vector.load %arg1[%c0, %c0_0, %c0_1, %c0_2] : memref<1x4x100x128xbf16, #tpu.memory_space<vmem>>, vector<1x1x100x128xbf16>
    %1 = vector.shape_cast %0 : vector<1x1x100x128xbf16> to vector<100x128xbf16>
    %2 = vector.extract_strided_slice %1 {offsets = [0, 0], sizes = [80, 128], strides = [1, 1]} : vector<100x128xbf16> to vector<80x128xbf16>
    %c0_3 = arith.constant 0 : index
    %c0_4 = arith.constant 0 : index
    %c0_5 = arith.constant 0 : index
    %3 = vector.load %arg2[%c0_3, %c0_4, %c0_5] : memref<9x128x128xbf16, #tpu.memory_space<vmem>>, vector<1x128x128xbf16>
    %4 = vector.shape_cast %3 : vector<1x128x128xbf16> to vector<128x128xbf16>
    %cst = arith.constant dense<0.000000e+00> : vector<80x128xf32>
    %5 = tpu.matmul %2, %4, %cst {dimension_numbers = #tpu.dot_dimension_numbers<[1], [0], [0], [1], [0, 0, 1, 1], [], []>} : vector<80x128xbf16>, vector<128x128xbf16>, vector<80x128xf32> -> vector<80x128xf32>
    %c0_6 = arith.constant 0 : index
    %c0_7 = arith.constant 0 : index
    %6 = vector.load %arg5[%c0_6, %c0_7] : memref<80x128xf32, #tpu.memory_space<vmem>>, vector<80x128xf32>
    tpu.vector_store %arg5[%c0_6, %c0_7], %5 {strides = array<i32>} : memref<80x128xf32, #tpu.memory_space<vmem>>, vector<80x128xf32>,
    %c0_8 = arith.constant 0 : index
    %c1 = arith.constant 1 : index
    %c0_9 = arith.constant 0 : index
    %c0_10 = arith.constant 0 : index
    %7 = vector.load %arg1[%c0_8, %c1, %c0_9, %c0_10] : memref<1x4x100x128xbf16, #tpu.memory_space<vmem>>, vector<1x1x100x128xbf16>
    %8 = vector.shape_cast %7 : vector<1x1x100x128xbf16> to vector<100x128xbf16>
    %9 = vector.extract_strided_slice %8 {offsets = [0, 0], sizes = [80, 128], strides = [1, 1]} : vector<100x128xbf16> to vector<80x128xbf16>
    %c1_11 = arith.constant 1 : index
    %c0_12 = arith.constant 0 : index
    %c0_13 = arith.constant 0 : index
    %10 = vector.load %arg2[%c1_11, %c0_12, %c0_13] : memref<9x128x128xbf16, #tpu.memory_space<vmem>>, vector<1x128x128xbf16>
    %11 = vector.shape_cast %10 : vector<1x128x128xbf16> to vector<128x128xbf16>
    %cst_14 = arith.constant dense<0.000000e+00> : vector<80x128xf32>
    %12 = tpu.matmul %9, %11, %cst_14 {dimension_numbers = #tpu.dot_dimension_numbers<[1], [0], [0], [1], [0, 0, 1, 1], [], []>} : vector<80x128xbf16>, vector<128x128xbf16>, vector<80x128xf32> -> vector<80x128xf32>
    %c0_15 = arith.constant 0 : index
    %c0_16 = arith.constant 0 : index
    %13 = vector.load %arg5[%c0_15, %c0_16] : memref<80x128xf32, #tpu.memory_space<vmem>>, vector<80x128xf32>
    %14 = arith.addf %13, %12 : vector<80x128xf32>
    %c0_17 = arith.constant 0 : index
    %c0_18 = arith.constant 0 : index
    %15 = vector.load %arg5[%c0_17, %c0_18] : memref<80x128xf32, #tpu.memory_space<vmem>>, vector<80x128xf32>
    tpu.vector_store %arg5[%c0_17, %c0_18], %14 {strides = array<i32>} : memref<80x128xf32, #tpu.memory_space<vmem>>, vector<80x128xf32>,
    %c0_19 = arith.constant 0 : index
    %c0_20 = arith.constant 0 : index
    %c0_21 = arith.constant 0 : index
    %c0_22 = arith.constant 0 : index
    %16 = vector.load %arg1[%c0_19, %c0_20, %c0_21, %c0_22] : memref<1x4x100x128xbf16, #tpu.memory_space<vmem>>, vector<1x1x100x128xbf16>
    %17 = vector.shape_cast %16 : vector<1x1x100x128xbf16> to vector<100x128xbf16>
    %18 = vector.extract_strided_slice %17 {offsets = [1, 0], sizes = [80, 128], strides = [1, 1]} : vector<100x128xbf16> to vector<80x128xbf16>
    %c2 = arith.constant 2 : index
    %c0_23 = arith.constant 0 : index
    %c0_24 = arith.constant 0 : index
    %19 = vector.load %arg2[%c2, %c0_23, %c0_24] : memref<9x128x128xbf16, #tpu.memory_space<vmem>>, vector<1x128x128xbf16>
    %20 = vector.shape_cast %19 : vector<1x128x128xbf16> to vector<128x128xbf16>
    %cst_25 = arith.constant dense<0.000000e+00> : vector<80x128xf32>
    %21 = tpu.matmul %18, %20, %cst_25 {dimension_numbers = #tpu.dot_dimension_numbers<[1], [0], [0], [1], [0, 0, 1, 1], [], []>} : vector<80x128xbf16>, vector<128x128xbf16>, vector<80x128xf32> -> vector<80x128xf32>
    %c0_26 = arith.constant 0 : index
    %c0_27 = arith.constant 0 : index
    %22 = vector.load %arg5[%c0_26, %c0_27] : memref<80x128xf32, #tpu.memory_space<vmem>>, vector<80x128xf32>
    %23 = arith.addf %22, %21 : vector<80x128xf32>
    %c0_28 = arith.constant 0 : index
    %c0_29 = arith.constant 0 : index
    %24 = vector.load %arg5[%c0_28, %c0_29] : memref<80x128xf32, #tpu.memory_space<vmem>>, vector<80x128xf32>
    tpu.vector_store %arg5[%c0_28, %c0_29], %23 {strides = array<i32>} : memref<80x128xf32, #tpu.memory_space<vmem>>, vector<80x128xf32>,
    %c0_30 = arith.constant 0 : index
    %c2_31 = arith.constant 2 : index
    %c0_32 = arith.constant 0 : index
    %c0_33 = arith.constant 0 : index
    %25 = vector.load %arg1[%c0_30, %c2_31, %c0_32, %c0_33] : memref<1x4x100x128xbf16, #tpu.memory_space<vmem>>, vector<1x1x100x128xbf16>
    %26 = vector.shape_cast %25 : vector<1x1x100x128xbf16> to vector<100x128xbf16>
    %27 = vector.extract_strided_slice %26 {offsets = [0, 0], sizes = [80, 128], strides = [1, 1]} : vector<100x128xbf16> to vector<80x128xbf16>
    %c3 = arith.constant 3 : index
    %c0_34 = arith.constant 0 : index
    %c0_35 = arith.constant 0 : index
    %28 = vector.load %arg2[%c3, %c0_34, %c0_35] : memref<9x128x128xbf16, #tpu.memory_space<vmem>>, vector<1x128x128xbf16>
    %29 = vector.shape_cast %28 : vector<1x128x128xbf16> to vector<128x128xbf16>
    %cst_36 = arith.constant dense<0.000000e+00> : vector<80x128xf32>
    %30 = tpu.matmul %27, %29, %cst_36 {dimension_numbers = #tpu.dot_dimension_numbers<[1], [0], [0], [1], [0, 0, 1, 1], [], []>} : vector<80x128xbf16>, vector<128x128xbf16>, vector<80x128xf32> -> vector<80x128xf32>
    %c0_37 = arith.constant 0 : index
    %c0_38 = arith.constant 0 : index
    %31 = vector.load %arg5[%c0_37, %c0_38] : memref<80x128xf32, #tpu.memory_space<vmem>>, vector<80x128xf32>
    %32 = arith.addf %31, %30 : vector<80x128xf32>
    %c0_39 = arith.constant 0 : index
    %c0_40 = arith.constant 0 : index
    %33 = vector.load %arg5[%c0_39, %c0_40] : memref<80x128xf32, #tpu.memory_space<vmem>>, vector<80x128xf32>
    tpu.vector_store %arg5[%c0_39, %c0_40], %32 {strides = array<i32>} : memref<80x128xf32, #tpu.memory_space<vmem>>, vector<80x128xf32>,
    %c0_41 = arith.constant 0 : index
    %c3_42 = arith.constant 3 : index
    %c0_43 = arith.constant 0 : index
    %c0_44 = arith.constant 0 : index
    %34 = vector.load %arg1[%c0_41, %c3_42, %c0_43, %c0_44] : memref<1x4x100x128xbf16, #tpu.memory_space<vmem>>, vector<1x1x100x128xbf16>
    %35 = vector.shape_cast %34 : vector<1x1x100x128xbf16> to vector<100x128xbf16>
    %36 = vector.extract_strided_slice %35 {offsets = [0, 0], sizes = [80, 128], strides = [1, 1]} : vector<100x128xbf16> to vector<80x128xbf16>
    %c4 = arith.constant 4 : index
    %c0_45 = arith.constant 0 : index
    %c0_46 = arith.constant 0 : index
    %37 = vector.load %arg2[%c4, %c0_45, %c0_46] : memref<9x128x128xbf16, #tpu.memory_space<vmem>>, vector<1x128x128xbf16>
    %38 = vector.shape_cast %37 : vector<1x128x128xbf16> to vector<128x128xbf16>
    %cst_47 = arith.constant dense<0.000000e+00> : vector<80x128xf32>
    %39 = tpu.matmul %36, %38, %cst_47 {dimension_numbers = #tpu.dot_dimension_numbers<[1], [0], [0], [1], [0, 0, 1, 1], [], []>} : vector<80x128xbf16>, vector<128x128xbf16>, vector<80x128xf32> -> vector<80x128xf32>
    %c0_48 = arith.constant 0 : index
    %c0_49 = arith.constant 0 : index
    %40 = vector.load %arg5[%c0_48, %c0_49] : memref<80x128xf32, #tpu.memory_space<vmem>>, vector<80x128xf32>
    %41 = arith.addf %40, %39 : vector<80x128xf32>
    %c0_50 = arith.constant 0 : index
    %c0_51 = arith.constant 0 : index
    %42 = vector.load %arg5[%c0_50, %c0_51] : memref<80x128xf32, #tpu.memory_space<vmem>>, vector<80x128xf32>
    tpu.vector_store %arg5[%c0_50, %c0_51], %41 {strides = array<i32>} : memref<80x128xf32, #tpu.memory_space<vmem>>, vector<80x128xf32>,
    %c0_52 = arith.constant 0 : index
    %c2_53 = arith.constant 2 : index
    %c0_54 = arith.constant 0 : index
    %c0_55 = arith.constant 0 : index
    %43 = vector.load %arg1[%c0_52, %c2_53, %c0_54, %c0_55] : memref<1x4x100x128xbf16, #tpu.memory_space<vmem>>, vector<1x1x100x128xbf16>
    %44 = vector.shape_cast %43 : vector<1x1x100x128xbf16> to vector<100x128xbf16>
    %45 = vector.extract_strided_slice %44 {offsets = [1, 0], sizes = [80, 128], strides = [1, 1]} : vector<100x128xbf16> to vector<80x128xbf16>
    %c5 = arith.constant 5 : index
    %c0_56 = arith.constant 0 : index
    %c0_57 = arith.constant 0 : index
    %46 = vector.load %arg2[%c5, %c0_56, %c0_57] : memref<9x128x128xbf16, #tpu.memory_space<vmem>>, vector<1x128x128xbf16>
    %47 = vector.shape_cast %46 : vector<1x128x128xbf16> to vector<128x128xbf16>
    %cst_58 = arith.constant dense<0.000000e+00> : vector<80x128xf32>
    %48 = tpu.matmul %45, %47, %cst_58 {dimension_numbers = #tpu.dot_dimension_numbers<[1], [0], [0], [1], [0, 0, 1, 1], [], []>} : vector<80x128xbf16>, vector<128x128xbf16>, vector<80x128xf32> -> vector<80x128xf32>
    %c0_59 = arith.constant 0 : index
    %c0_60 = arith.constant 0 : index
    %49 = vector.load %arg5[%c0_59, %c0_60] : memref<80x128xf32, #tpu.memory_space<vmem>>, vector<80x128xf32>
    %50 = arith.addf %49, %48 : vector<80x128xf32>
    %c0_61 = arith.constant 0 : index
    %c0_62 = arith.constant 0 : index
    %51 = vector.load %arg5[%c0_61, %c0_62] : memref<80x128xf32, #tpu.memory_space<vmem>>, vector<80x128xf32>
    tpu.vector_store %arg5[%c0_61, %c0_62], %50 {strides = array<i32>} : memref<80x128xf32, #tpu.memory_space<vmem>>, vector<80x128xf32>,
    %c0_63 = arith.constant 0 : index
    %c0_64 = arith.constant 0 : index
    %c0_65 = arith.constant 0 : index
    %c0_66 = arith.constant 0 : index
    %52 = vector.load %arg1[%c0_63, %c0_64, %c0_65, %c0_66] : memref<1x4x100x128xbf16, #tpu.memory_space<vmem>>, vector<1x1x100x128xbf16>
    %53 = vector.shape_cast %52 : vector<1x1x100x128xbf16> to vector<100x128xbf16>
    %54 = vector.extract_strided_slice %53 {offsets = [10, 0], sizes = [80, 128], strides = [1, 1]} : vector<100x128xbf16> to vector<80x128xbf16>
    %c6 = arith.constant 6 : index
    %c0_67 = arith.constant 0 : index
    %c0_68 = arith.constant 0 : index
    %55 = vector.load %arg2[%c6, %c0_67, %c0_68] : memref<9x128x128xbf16, #tpu.memory_space<vmem>>, vector<1x128x128xbf16>
    %56 = vector.shape_cast %55 : vector<1x128x128xbf16> to vector<128x128xbf16>
    %cst_69 = arith.constant dense<0.000000e+00> : vector<80x128xf32>
    %57 = tpu.matmul %54, %56, %cst_69 {dimension_numbers = #tpu.dot_dimension_numbers<[1], [0], [0], [1], [0, 0, 1, 1], [], []>} : vector<80x128xbf16>, vector<128x128xbf16>, vector<80x128xf32> -> vector<80x128xf32>
    %c0_70 = arith.constant 0 : index
    %c0_71 = arith.constant 0 : index
    %58 = vector.load %arg5[%c0_70, %c0_71] : memref<80x128xf32, #tpu.memory_space<vmem>>, vector<80x128xf32>
    %59 = arith.addf %58, %57 : vector<80x128xf32>
    %c0_72 = arith.constant 0 : index
    %c0_73 = arith.constant 0 : index
    %60 = vector.load %arg5[%c0_72, %c0_73] : memref<80x128xf32, #tpu.memory_space<vmem>>, vector<80x128xf32>
    tpu.vector_store %arg5[%c0_72, %c0_73], %59 {strides = array<i32>} : memref<80x128xf32, #tpu.memory_space<vmem>>, vector<80x128xf32>,
    %c0_74 = arith.constant 0 : index
    %c1_75 = arith.constant 1 : index
    %c0_76 = arith.constant 0 : index
    %c0_77 = arith.constant 0 : index
    %61 = vector.load %arg1[%c0_74, %c1_75, %c0_76, %c0_77] : memref<1x4x100x128xbf16, #tpu.memory_space<vmem>>, vector<1x1x100x128xbf16>
    %62 = vector.shape_cast %61 : vector<1x1x100x128xbf16> to vector<100x128xbf16>
    %63 = vector.extract_strided_slice %62 {offsets = [10, 0], sizes = [80, 128], strides = [1, 1]} : vector<100x128xbf16> to vector<80x128xbf16>
    %c7 = arith.constant 7 : index
    %c0_78 = arith.constant 0 : index
    %c0_79 = arith.constant 0 : index
    %64 = vector.load %arg2[%c7, %c0_78, %c0_79] : memref<9x128x128xbf16, #tpu.memory_space<vmem>>, vector<1x128x128xbf16>
    %65 = vector.shape_cast %64 : vector<1x128x128xbf16> to vector<128x128xbf16>
    %cst_80 = arith.constant dense<0.000000e+00> : vector<80x128xf32>
    %66 = tpu.matmul %63, %65, %cst_80 {dimension_numbers = #tpu.dot_dimension_numbers<[1], [0], [0], [1], [0, 0, 1, 1], [], []>} : vector<80x128xbf16>, vector<128x128xbf16>, vector<80x128xf32> -> vector<80x128xf32>
    %c0_81 = arith.constant 0 : index
    %c0_82 = arith.constant 0 : index
    %67 = vector.load %arg5[%c0_81, %c0_82] : memref<80x128xf32, #tpu.memory_space<vmem>>, vector<80x128xf32>
    %68 = arith.addf %67, %66 : vector<80x128xf32>
    %c0_83 = arith.constant 0 : index
    %c0_84 = arith.constant 0 : index
    %69 = vector.load %arg5[%c0_83, %c0_84] : memref<80x128xf32, #tpu.memory_space<vmem>>, vector<80x128xf32>
    tpu.vector_store %arg5[%c0_83, %c0_84], %68 {strides = array<i32>} : memref<80x128xf32, #tpu.memory_space<vmem>>, vector<80x128xf32>,
    %c0_85 = arith.constant 0 : index
    %c0_86 = arith.constant 0 : index
    %c0_87 = arith.constant 0 : index
    %c0_88 = arith.constant 0 : index
    %70 = vector.load %arg1[%c0_85, %c0_86, %c0_87, %c0_88] : memref<1x4x100x128xbf16, #tpu.memory_space<vmem>>, vector<1x1x100x128xbf16>
    %71 = vector.shape_cast %70 : vector<1x1x100x128xbf16> to vector<100x128xbf16>
    %72 = vector.extract_strided_slice %71 {offsets = [11, 0], sizes = [80, 128], strides = [1, 1]} : vector<100x128xbf16> to vector<80x128xbf16>
    %c8 = arith.constant 8 : index
    %c0_89 = arith.constant 0 : index
    %c0_90 = arith.constant 0 : index
    %73 = vector.load %arg2[%c8, %c0_89, %c0_90] : memref<9x128x128xbf16, #tpu.memory_space<vmem>>, vector<1x128x128xbf16>
    %74 = vector.shape_cast %73 : vector<1x128x128xbf16> to vector<128x128xbf16>
    %cst_91 = arith.constant dense<0.000000e+00> : vector<80x128xf32>
    %75 = tpu.matmul %72, %74, %cst_91 {dimension_numbers = #tpu.dot_dimension_numbers<[1], [0], [0], [1], [0, 0, 1, 1], [], []>} : vector<80x128xbf16>, vector<128x128xbf16>, vector<80x128xf32> -> vector<80x128xf32>
    %c0_92 = arith.constant 0 : index
    %c0_93 = arith.constant 0 : index
    %76 = vector.load %arg5[%c0_92, %c0_93] : memref<80x128xf32, #tpu.memory_space<vmem>>, vector<80x128xf32>
    %77 = arith.addf %76, %75 : vector<80x128xf32>
    %c0_94 = arith.constant 0 : index
    %c0_95 = arith.constant 0 : index
    %78 = vector.load %arg5[%c0_94, %c0_95] : memref<80x128xf32, #tpu.memory_space<vmem>>, vector<80x128xf32>
    tpu.vector_store %arg5[%c0_94, %c0_95], %77 {strides = array<i32>} : memref<80x128xf32, #tpu.memory_space<vmem>>, vector<80x128xf32>,
    %c0_96 = arith.constant 0 : index
    %c0_97 = arith.constant 0 : index
    %79 = vector.load %arg5[%c0_96, %c0_97] : memref<80x128xf32, #tpu.memory_space<vmem>>, vector<80x128xf32>
    %c0_98 = arith.constant 0 : index
    %c0_99 = arith.constant 0 : index
    %80 = vector.load %arg3[%c0_98, %c0_99] : memref<1x128xf32, #tpu.memory_space<vmem>>, vector<1x128xf32>
    %81 = vector.broadcast %80 : vector<1x128xf32> to vector<80x128xf32>
    %82 = arith.addf %79, %81 : vector<80x128xf32>
    %cst_100 = arith.constant 0.000000e+00 : f32
    %83 = vector.broadcast %cst_100 : f32 to vector<80x128xf32>
    %84 = arith.maximumf %82, %83 : vector<80x128xf32>
    %85 = arith.truncf %84 : vector<80x128xf32> to vector<80x128xbf16>
    %c0_101 = arith.constant 0 : index
    %c0_102 = arith.constant 0 : index
    %c0_103 = arith.constant 0 : index
    %86 = vector.load %arg4[%c0_101, %c0_102, %c0_103] : memref<1x80x128xbf16, #tpu.memory_space<vmem>>, vector<1x80x128xbf16>
    %87 = vector.shape_cast %86 : vector<1x80x128xbf16> to vector<80x128xbf16>
    %88 = vector.shape_cast %85 : vector<80x128xbf16> to vector<1x80x128xbf16>
    tpu.vector_store %arg4[%c0_101, %c0_102, %c0_103], %88 {strides = array<i32>} : memref<1x80x128xbf16, #tpu.memory_space<vmem>>, vector<1x80x128xbf16>,
    return
  }
  func.func @transform_0(%arg0: i32) -> (i32, i32, i32, i32) {
    %c0_i32 = arith.constant 0 : i32
    %c0_i32_0 = arith.constant 0 : i32
    %c0_i32_1 = arith.constant 0 : i32
    %c0_i32_2 = arith.constant 0 : i32
    return %arg0, %c0_i32, %c0_i32_0, %c0_i32_1 : i32, i32, i32, i32
  }
  func.func @transform_1(%arg0: i32) -> (i32, i32, i32) {
    %c0_i32 = arith.constant 0 : i32
    %c0_i32_0 = arith.constant 0 : i32
    %c0_i32_1 = arith.constant 0 : i32
    %c0_i32_2 = arith.constant 0 : i32
    return %c0_i32, %c0_i32_0, %c0_i32_1 : i32, i32, i32
  }
  func.func @transform_2(%arg0: i32) -> (i32, i32) {
    %c0_i32 = arith.constant 0 : i32
    %c0_i32_0 = arith.constant 0 : i32
    %c0_i32_1 = arith.constant 0 : i32
    return %c0_i32, %c0_i32_0 : i32, i32
  }
  func.func @transform_3(%arg0: i32) -> (i32, i32, i32) {
    %c0_i32 = arith.constant 0 : i32
    %c0_i32_0 = arith.constant 0 : i32
    %c0_i32_1 = arith.constant 0 : i32
    return %arg0, %c0_i32, %c0_i32_0 : i32, i32, i32
  }
}

module attributes {stable_mosaic.version = 11 : i64} {
  func.func @kernel(%arg0: i32, %arg1: i32, %arg2: i32, %arg3: memref<64x128xbf16, #tpu.memory_space<vmem>>, %arg4: memref<128x128xbf16, #tpu.memory_space<vmem>>, %arg5: memref<1x128xf32, #tpu.memory_space<vmem>>, %arg6: memref<64x128xbf16, #tpu.memory_space<vmem>>, %arg7: memref<128x128xbf16, #tpu.memory_space<vmem>>, %arg8: memref<1x128xf32, #tpu.memory_space<vmem>>, %arg9: memref<64x128xbf16, #tpu.memory_space<vmem>>, %arg10: memref<64x128xf32, #tpu.memory_space<vmem>>) attributes {dimension_semantics = [#tpu.dimension_semantics<parallel>, #tpu.dimension_semantics<parallel>, #tpu.dimension_semantics<arbitrary>], iteration_bounds = array<i64: 2, 1, 1>, scalar_prefetch = 0 : i64, scratch_operands = 1 : i64, tpu.core_type = #tpu.core_type<tc>, window_params = [{transform_indices = @transform_0, window_bounds = array<i64: 64, 128>}, {transform_indices = @transform_1, window_bounds = array<i64: 128, 128>}, {transform_indices = @transform_2, window_bounds = array<i64: 1, 128>}, {transform_indices = @transform_3, window_bounds = array<i64: 64, 128>}, {transform_indices = @transform_4, window_bounds = array<i64: 128, 128>}, {transform_indices = @transform_5, window_bounds = array<i64: 1, 128>}, {transform_indices = @transform_6, window_bounds = array<i64: 64, 128>}]} {
    %c0_i32 = arith.constant 0 : i32
    %0 = arith.cmpi eq, %arg2, %c0_i32 : i32
    %1 = arith.extui %0 : i1 to i32
    %c0_i32_0 = arith.constant 0 : i32
    %2 = arith.cmpi ne, %1, %c0_i32_0 : i32
    scf.if %2 {
      %c0_10 = arith.constant 0 : index
      %c0_11 = arith.constant 0 : index
      %12 = vector.load %arg6[%c0_10, %c0_11] : memref<64x128xbf16, #tpu.memory_space<vmem>>, vector<64x128xbf16>
      %c0_12 = arith.constant 0 : index
      %c0_13 = arith.constant 0 : index
      %13 = vector.load %arg7[%c0_12, %c0_13] : memref<128x128xbf16, #tpu.memory_space<vmem>>, vector<128x128xbf16>
      %cst_14 = arith.constant dense<0.000000e+00> : vector<64x128xf32>
      %14 = tpu.matmul %12, %13, %cst_14 {dimension_numbers = #tpu.dot_dimension_numbers<[1], [0], [0], [1], [0, 0, 1, 1], [], []>} : vector<64x128xbf16>, vector<128x128xbf16>, vector<64x128xf32> -> vector<64x128xf32>
      %c0_15 = arith.constant 0 : index
      %c0_16 = arith.constant 0 : index
      %15 = vector.load %arg8[%c0_15, %c0_16] : memref<1x128xf32, #tpu.memory_space<vmem>>, vector<1x128xf32>
      %16 = vector.broadcast %15 : vector<1x128xf32> to vector<64x128xf32>
      %17 = arith.addf %14, %16 : vector<64x128xf32>
      %c0_17 = arith.constant 0 : index
      %c0_18 = arith.constant 0 : index
      %18 = vector.load %arg5[%c0_17, %c0_18] : memref<1x128xf32, #tpu.memory_space<vmem>>, vector<1x128xf32>
      %19 = vector.broadcast %18 : vector<1x128xf32> to vector<64x128xf32>
      %20 = arith.addf %17, %19 : vector<64x128xf32>
      %c0_19 = arith.constant 0 : index
      %c0_20 = arith.constant 0 : index
      %21 = vector.load %arg10[%c0_19, %c0_20] : memref<64x128xf32, #tpu.memory_space<vmem>>, vector<64x128xf32>
      tpu.vector_store %arg10[%c0_19, %c0_20], %20 {strides = array<i32>} : memref<64x128xf32, #tpu.memory_space<vmem>>, vector<64x128xf32>,
    } else {
    }
    %c0 = arith.constant 0 : index
    %c0_1 = arith.constant 0 : index
    %3 = vector.load %arg10[%c0, %c0_1] : memref<64x128xf32, #tpu.memory_space<vmem>>, vector<64x128xf32>
    %c0_2 = arith.constant 0 : index
    %c0_3 = arith.constant 0 : index
    %4 = vector.load %arg3[%c0_2, %c0_3] : memref<64x128xbf16, #tpu.memory_space<vmem>>, vector<64x128xbf16>
    %c0_4 = arith.constant 0 : index
    %c0_5 = arith.constant 0 : index
    %5 = vector.load %arg4[%c0_4, %c0_5] : memref<128x128xbf16, #tpu.memory_space<vmem>>, vector<128x128xbf16>
    %cst = arith.constant dense<0.000000e+00> : vector<64x128xf32>
    %6 = tpu.matmul %4, %5, %cst {dimension_numbers = #tpu.dot_dimension_numbers<[1], [0], [0], [1], [0, 0, 1, 1], [], []>} : vector<64x128xbf16>, vector<128x128xbf16>, vector<64x128xf32> -> vector<64x128xf32>
    %7 = arith.addf %3, %6 : vector<64x128xf32>
    %c0_6 = arith.constant 0 : index
    %c0_7 = arith.constant 0 : index
    %8 = vector.load %arg10[%c0_6, %c0_7] : memref<64x128xf32, #tpu.memory_space<vmem>>, vector<64x128xf32>
    tpu.vector_store %arg10[%c0_6, %c0_7], %7 {strides = array<i32>} : memref<64x128xf32, #tpu.memory_space<vmem>>, vector<64x128xf32>,
    %c0_i32_8 = arith.constant 0 : i32
    %9 = arith.cmpi eq, %arg2, %c0_i32_8 : i32
    %10 = arith.extui %9 : i1 to i32
    %c0_i32_9 = arith.constant 0 : i32
    %11 = arith.cmpi ne, %10, %c0_i32_9 : i32
    scf.if %11 {
      %c0_10 = arith.constant 0 : index
      %c0_11 = arith.constant 0 : index
      %12 = vector.load %arg10[%c0_10, %c0_11] : memref<64x128xf32, #tpu.memory_space<vmem>>, vector<64x128xf32>
      %cst_12 = arith.constant 0.000000e+00 : f32
      %13 = vector.broadcast %cst_12 : f32 to vector<64x128xf32>
      %14 = arith.maximumf %12, %13 : vector<64x128xf32>
      %15 = arith.truncf %14 : vector<64x128xf32> to vector<64x128xbf16>
      %c0_13 = arith.constant 0 : index
      %c0_14 = arith.constant 0 : index
      %16 = vector.load %arg9[%c0_13, %c0_14] : memref<64x128xbf16, #tpu.memory_space<vmem>>, vector<64x128xbf16>
      tpu.vector_store %arg9[%c0_13, %c0_14], %15 {strides = array<i32>} : memref<64x128xbf16, #tpu.memory_space<vmem>>, vector<64x128xbf16>,
    } else {
    }
    return
  }
  func.func @transform_0(%arg0: i32, %arg1: i32, %arg2: i32) -> (i32, i32) {
    %c0_i32 = arith.constant 0 : i32
    return %arg0, %arg2 : i32, i32
  }
  func.func @transform_1(%arg0: i32, %arg1: i32, %arg2: i32) -> (i32, i32) {
    %c0_i32 = arith.constant 0 : i32
    return %arg2, %arg1 : i32, i32
  }
  func.func @transform_2(%arg0: i32, %arg1: i32, %arg2: i32) -> (i32, i32) {
    %c0_i32 = arith.constant 0 : i32
    %c0_i32_0 = arith.constant 0 : i32
    return %c0_i32, %arg1 : i32, i32
  }
  func.func @transform_3(%arg0: i32, %arg1: i32, %arg2: i32) -> (i32, i32) {
    %c0_i32 = arith.constant 0 : i32
    %c0_i32_0 = arith.constant 0 : i32
    return %arg0, %c0_i32 : i32, i32
  }
  func.func @transform_4(%arg0: i32, %arg1: i32, %arg2: i32) -> (i32, i32) {
    %c0_i32 = arith.constant 0 : i32
    %c0_i32_0 = arith.constant 0 : i32
    return %c0_i32, %arg1 : i32, i32
  }
  func.func @transform_5(%arg0: i32, %arg1: i32, %arg2: i32) -> (i32, i32) {
    %c0_i32 = arith.constant 0 : i32
    %c0_i32_0 = arith.constant 0 : i32
    return %c0_i32, %arg1 : i32, i32
  }
  func.func @transform_6(%arg0: i32, %arg1: i32, %arg2: i32) -> (i32, i32) {
    %c0_i32 = arith.constant 0 : i32
    return %arg0, %arg1 : i32, i32
  }
}

</mosaic_0001>

<bundles_post_ra>
// kernel: bottle_top_pallas.3
= control target key start
LH: loop header
LB: loop body
LE: loop exit
PB: predicated region body
PF: predicated region fallthrough
CT: control target
= control target key end

     0   :  { %s1467_s12 = smov 0   ;;  %s1469_s13 = smov 0   ;;  %s1604_s0 = inlined_call_operand.vmem [shape: bf16[512,128], index: 0, kind: input, shape index: {}]   ;;  %s1605_s1 = inlined_call_operand.vmem [shape: bf16[128,128], index: 1, kind: input, shape index: {}]   ;;  %s1606_s2 = inlined_call_operand.vmem [shape: f32[1,128], index: 2, kind: input, shape index: {}]   ;;  %s1607_s3 = inlined_call_operand.vmem [shape: bf16[512,128], index: 3, kind: output, shape index: {}]  }
   0x1   :  { %s1471_s14 = smov 0  }
   0x2 LB: > { %s32_s15 = sadd.s32 1, %s1441_s13  ;;  %p1096_p0 = scmp.ge.s32.totalorder %s1445_s14, 1  ;;  %s1445_s14 = sphi %s1471_s14, %s13_s14   ;;  %s1441_s13 = sphi %s1469_s13, %s1609_s13   ;;  %s1437_s12 = sphi %s1467_s12, %s1608_s12  }
   0x3   : > { %p34_p1 = scmp.ge.s32.totalorder %s32_s15, 2  ;;  %p188_p2 = scmp.lt.s32.totalorder %s1445_s14, 3 }
   0x5   : > { %s1611_s15 = smov (%p34_p1, %s32_s15), 0  ;;  %p189_p3 = pnand %p1096_p0, %p188_p2 }
   0x6   : > { %v1399_v0 = vld [vmem:[%s1605_s1] sm:$0xff] (!%p189_p3)   ;;  %s1097_s18 = sshll.u32 (!%p189_p3), %s1437_s12, 5  ;;  %v1400_v1 = vld [vmem:[%s1605_s1 + $0x8] sm:$0xff] (!%p189_p3)   ;;  %v1401_v2 = vld [vmem:[%s1605_s1 + $0x10] sm:$0xff] (!%p189_p3)  }
   0x7   : > { %192 = sbr.rel (%p189_p3) target bundleno = 285 (0x11d), region = 32  ;;  %p230_p4 = scmp.lt.s32.totalorder (!%p189_p3), %s1097_s18, 63  ;;  %1311 = vmatprep.subr.bf16.mxu0 (!%p189_p3), %v1399_v0  ;;  %1359 = vmatprep.subr.bf16.mxu1 (!%p189_p3), %v1399_v0  ;;  %v1402_v3 = vld [vmem:[%s1605_s1 + $0x18] sm:$0xff] (!%p189_p3)   ;;  %v1403_v6 = vld [vmem:[%s1605_s1 + $0x20] sm:$0xff] (!%p189_p3)   ;;  %v1404_v7 = vld [vmem:[%s1605_s1 + $0x28] sm:$0xff] (!%p189_p3)  }
   0x8   : > { %1312 = vmatpush3.bf16.msra.mxu0 (!%p189_p3), %v1399_v0  ;;  %1367 = vmatpush3.bf16.msra.mxu1 (!%p189_p3), %v1399_v0  ;;  %v1405_v8 = vld [vmem:[%s1605_s1 + $0x30] sm:$0xff] (!%p189_p3)   ;;  %v1406_v9 = vld [vmem:[%s1605_s1 + $0x38] sm:$0xff] (!%p189_p3)   ;;  %v1538_v24 = vld [vmem:[%s1606_s2] ss:$0 sm:$0xff] (!%p189_p3) }
   0x9   : > { %1313 = vmatprep.subr.bf16.mxu0 (!%p189_p3), %v1400_v1  ;;  %1360 = vmatprep.subr.bf16.mxu1 (!%p189_p3), %v1400_v1 }
   0xc   : > { %1314 = vmatpush3.bf16.msra.mxu0 (!%p189_p3), %v1400_v1  ;;  %1368 = vmatpush3.bf16.msra.mxu1 (!%p189_p3), %v1400_v1 }
   0xd   : > { %1315 = vmatprep.subr.bf16.mxu0 (!%p189_p3), %v1401_v2  ;;  %1361 = vmatprep.subr.bf16.mxu1 (!%p189_p3), %v1401_v2 }
   0xe   : > { %s1613_s18 = smov (!%p230_p4, %s1097_s18), 63 }
   0xf   : > { %s1098_s23 = sshll.u32 %s1613_s18, 2 }
  0x10   : > { %s1502_s26 = scalar_lea.vmem %s1604_s0, %s1098_s23  ;;  %1316 = vmatpush3.bf16.msra.mxu0 %v1401_v2  ;;  %1369 = vmatpush3.bf16.msra.mxu1 %v1401_v2  ;;  %s1553_s17 = scalar_lea.vmem %s1607_s3, %s1098_s23 }
  0x11   : > { %v1407_v4 = vld [vmem:[%s1502_s26] sm:$0xff]   ;;  %1317 = vmatprep.subr.bf16.mxu0 %v1402_v3  ;;  %1362 = vmatprep.subr.bf16.mxu1 %v1402_v3  ;;  %v1409_v10 = vld [vmem:[%s1502_s26 + $0x8] sm:$0xff]   ;;  %v1411_v12 = vld [vmem:[%s1502_s26 + $0x10] sm:$0xff]  }
  0x12   : > { %v1408_v5 = vld [vmem:[%s1502_s26 + $0x40] sm:$0xff]   ;;  %1327 = vmatprep.mubr.bf16.mxu0 %v1407_v4  ;;  %v1410_v11 = vld [vmem:[%s1502_s26 + $0x48] sm:$0xff]   ;;  %v1412_v13 = vld [vmem:[%s1502_s26 + $0x50] sm:$0xff]  }
  0x13   : > { %1343 = vmatprep.mubr.bf16.mxu1 %v1408_v5  ;;  %v1413_v14 = vld [vmem:[%s1502_s26 + $0x18] sm:$0xff]   ;;  %v1415_v16 = vld [vmem:[%s1502_s26 + $0x20] sm:$0xff]   ;;  %v1417_v18 = vld [vmem:[%s1502_s26 + $0x28] sm:$0xff]  }
  0x14   : > { %1318 = vmatpush3.bf16.msra.mxu0 %v1402_v3  ;;  %1370 = vmatpush3.bf16.msra.mxu1 %v1402_v3  ;;  %v1414_v15 = vld [vmem:[%s1502_s26 + $0x58] sm:$0xff]   ;;  %v1416_v17 = vld [vmem:[%s1502_s26 + $0x60] sm:$0xff]   ;;  %v1418_v19 = vld [vmem:[%s1502_s26 + $0x68] sm:$0xff]  }
  0x15   : > { %1319 = vmatprep.subr.bf16.mxu0 %v1403_v6  ;;  %1363 = vmatprep.subr.bf16.mxu1 %v1403_v6  ;;  %v1419_v20 = vld [vmem:[%s1502_s26 + $0x30] sm:$0xff]   ;;  %v1421_v22 = vld [vmem:[%s1502_s26 + $0x38] sm:$0xff]  }
  0x16   : > { %v1420_v21 = vld [vmem:[%s1502_s26 + $0x70] sm:$0xff]   ;;  %v1422_v23 = vld [vmem:[%s1502_s26 + $0x78] sm:$0xff]  }
  0x18   : > { %1320 = vmatpush3.bf16.msra.mxu0 %v1403_v6  ;;  %1371 = vmatpush3.bf16.msra.mxu1 %v1403_v6 }
  0x19   : > { %1321 = vmatprep.subr.bf16.mxu0 %v1404_v7  ;;  %1364 = vmatprep.subr.bf16.mxu1 %v1404_v7 }
  0x1c   : > { %1322 = vmatpush3.bf16.msra.mxu0 %v1404_v7  ;;  %1372 = vmatpush3.bf16.msra.mxu1 %v1404_v7 }
  0x1d   : > { %1323 = vmatprep.subr.bf16.mxu0 %v1405_v8  ;;  %1365 = vmatprep.subr.bf16.mxu1 %v1405_v8 }
  0x20   : > { %1324 = vmatpush3.bf16.msra.mxu0 %v1405_v8  ;;  %1373 = vmatpush3.bf16.msra.mxu1 %v1405_v8 }
  0x21   : > { %1325 = vmatprep.subr.bf16.mxu0 %v1406_v9  ;;  %1366 = vmatprep.subr.bf16.mxu1 %v1406_v9 }
  0x24   : > { %1326 = vmatpush3.bf16.msra.mxu0 %v1406_v9  ;;  %1374 = vmatpush3.bf16.msra.mxu1 %v1406_v9 }
  0x27   : > { %1328 = vmatmul.mubr.bf16.vlgmr.msra.gmra.mrb[0].mxu0 %v1409_v10  ;;  %1344 = vmatmul.mubr.bf16.vlgmr.msra.gmra.mrb[0].mxu1 %v1410_v11 }
  0x28   : > { %1331 = vmatprep.mubr.bf16.mxu0 %v1411_v12  ;;  %1347 = vmatprep.mubr.bf16.mxu1 %v1412_v13 }
  0x2f   : > { %1332 = vmatmul.mubr.bf16.gmra.mrb[4].mxu0 %v1413_v14  ;;  %1348 = vmatmul.mubr.bf16.gmra.mrb[4].mxu1 %v1414_v15 }
  0x30   : > { %1335 = vmatprep.mubr.bf16.mxu0 %v1415_v16  ;;  %1351 = vmatprep.mubr.bf16.mxu1 %v1416_v17 }
  0x37   : > { %1336 = vmatmul.mubr.bf16.gmra.mrb[8].mxu0 %v1417_v18  ;;  %1352 = vmatmul.mubr.bf16.gmra.mrb[8].mxu1 %v1418_v19 }
  0x38   : > { %1339 = vmatprep.mubr.bf16.mxu0 %v1419_v20  ;;  %1355 = vmatprep.mubr.bf16.mxu1 %v1420_v21 }
  0x3f   : > { %1340 = vmatmul.mubr.bf16.gmra.mrb[12].mxu0 %v1421_v22  ;;  %1356 = vmatmul.mubr.bf16.gmra.mrb[12].mxu1 %v1422_v23 }
  0xfa   : > { %v1329_v25 = vpop.f32.mrb[0].mxu0  ;;  %v1345_v26 = vpop.f32.mrb[0].mxu1 }
  0xfb   : > { %v690_v27 = vadd.f32 %v1329_v25, %v1538_v24  ;;  %v706_v28 = vadd.f32 %v1345_v26, %v1538_v24  ;;  %v561_v29 = vpop.f32.mrb[1].mxu0  ;;  %v625_v30 = vpop.f32.mrb[1].mxu1 }
  0xfc   : > { %v688_v31 = vadd.f32 %v1538_v24, %v561_v29  ;;  %v704_v32 = vadd.f32 %v1538_v24, %v625_v30  ;;  %v1330_v33 = vpop.f32.mrb[2].mxu0  ;;  %v1346_v34 = vpop.f32.mrb[2].mxu1 }
  0xfd   : > { %v691_v35 = vadd.f32 %v1330_v33, %v1538_v24  ;;  %v707_v36 = vadd.f32 %v1346_v34, %v1538_v24  ;;  %v564_v37 = vpop.f32.mrb[3].mxu0  ;;  %v628_v38 = vpop.f32.mrb[3].mxu1  ;;  %v789_v41 = vmax.f32 %v690_v27, 0.0  ;;  %v805_v42 = vmax.f32 %v706_v28, 0.0 }
  0xfe   : > { %v689_v39 = vadd.f32 %v1538_v24, %v564_v37  ;;  %v705_v40 = vadd.f32 %v1538_v24, %v628_v38  ;;  %v787_v45 = vmax.f32 %v688_v31, 0.0  ;;  %v803_v46 = vmax.f32 %v704_v32, 0.0 }
  0xff   : > { %v790_v43 = vmax.f32 %v691_v35, 0.0  ;;  %v806_v44 = vmax.f32 %v707_v36, 0.0 }
 0x100   : > { %v788_v47 = vmax.f32 %v689_v39, 0.0  ;;  %v804_v48 = vmax.f32 %v705_v40, 0.0 }
 0x101   : > { %v1200_v49 = vpack.c.bf16 %v790_v43, %v789_v41  ;;  %v1240_v50 = vpack.c.bf16 %v806_v44, %v805_v42 }
 0x102   : > { %v1195_v51 = vpack.c.bf16 %v788_v47, %v787_v45  ;;  %v1235_v52 = vpack.c.bf16 %v804_v48, %v803_v46  ;;  %v1333_v53 = vpop.f32.mrb[4].mxu0  ;;  %v1349_v54 = vpop.f32.mrb[4].mxu1 }
 0x103   : > { %1272 = vst [vmem:[%s1553_s17 + $0x8] sm:$0xff] %v1200_v49   ;;  %1280 = vst [vmem:[%s1553_s17 + $0x48] sm:$0xff] %v1240_v50   ;;  %v694_v55 = vadd.f32 %v1333_v53, %v1538_v24  ;;  %v710_v56 = vadd.f32 %v1349_v54, %v1538_v24  ;;  %v577_v57 = vpop.f32.mrb[5].mxu0  ;;  %v641_v58 = vpop.f32.mrb[5].mxu1 }
 0x104   : > { %1196 = vst [vmem:[%s1553_s17] sm:$0xff] %v1195_v51   ;;  %1279 = vst [vmem:[%s1553_s17 + $0x40] sm:$0xff] %v1235_v52   ;;  %v692_v59 = vadd.f32 %v1538_v24, %v577_v57  ;;  %v708_v60 = vadd.f32 %v1538_v24, %v641_v58  ;;  %v1334_v61 = vpop.f32.mrb[6].mxu0  ;;  %v1350_v62 = vpop.f32.mrb[6].mxu1 }
 0x105   : > { %v695_v63 = vadd.f32 %v1334_v61, %v1538_v24  ;;  %v711_v0 = vadd.f32 %v1350_v62, %v1538_v24  ;;  %v580_v1 = vpop.f32.mrb[7].mxu0  ;;  %v644_v2 = vpop.f32.mrb[7].mxu1  ;;  %v793_v5 = vmax.f32 %v694_v55, 0.0  ;;  %v809_v6 = vmax.f32 %v710_v56, 0.0 }
 0x106   : > { %v693_v3 = vadd.f32 %v1538_v24, %v580_v1  ;;  %v709_v4 = vadd.f32 %v1538_v24, %v644_v2  ;;  %v791_v9 = vmax.f32 %v692_v59, 0.0  ;;  %v807_v10 = vmax.f32 %v708_v60, 0.0 }
 0x107   : > { %v794_v7 = vmax.f32 %v695_v63, 0.0  ;;  %v810_v8 = vmax.f32 %v711_v0, 0.0 }
 0x108   : > { %v792_v11 = vmax.f32 %v693_v3, 0.0  ;;  %v808_v12 = vmax.f32 %v709_v4, 0.0 }
 0x109   : > { %v1210_v13 = vpack.c.bf16 %v794_v7, %v793_v5  ;;  %v1250_v14 = vpack.c.bf16 %v810_v8, %v809_v6 }
 0x10a   : > { %v1205_v15 = vpack.c.bf16 %v792_v11, %v791_v9  ;;  %v1245_v16 = vpack.c.bf16 %v808_v12, %v807_v10  ;;  %v1337_v17 = vpop.f32.mrb[8].mxu0  ;;  %v1353_v18 = vpop.f32.mrb[8].mxu1 }
 0x10b   : > { %1274 = vst [vmem:[%s1553_s17 + $0x18] sm:$0xff] %v1210_v13   ;;  %1282 = vst [vmem:[%s1553_s17 + $0x58] sm:$0xff] %v1250_v14   ;;  %v698_v19 = vadd.f32 %v1337_v17, %v1538_v24  ;;  %v714_v20 = vadd.f32 %v1353_v18, %v1538_v24  ;;  %v593_v21 = vpop.f32.mrb[9].mxu0  ;;  %v657_v22 = vpop.f32.mrb[9].mxu1 }
 0x10c   : > { %1273 = vst [vmem:[%s1553_s17 + $0x10] sm:$0xff] %v1205_v15   ;;  %1281 = vst [vmem:[%s1553_s17 + $0x50] sm:$0xff] %v1245_v16   ;;  %v696_v23 = vadd.f32 %v1538_v24, %v593_v21  ;;  %v712_v25 = vadd.f32 %v1538_v24, %v657_v22  ;;  %v1338_v26 = vpop.f32.mrb[10].mxu0  ;;  %v1354_v27 = vpop.f32.mrb[10].mxu1 }
 0x10d   : > { %v699_v28 = vadd.f32 %v1338_v26, %v1538_v24  ;;  %v715_v29 = vadd.f32 %v1354_v27, %v1538_v24  ;;  %v596_v30 = vpop.f32.mrb[11].mxu0  ;;  %v660_v31 = vpop.f32.mrb[11].mxu1  ;;  %v797_v34 = vmax.f32 %v698_v19, 0.0  ;;  %v813_v35 = vmax.f32 %v714_v20, 0.0 }
 0x10e   : > { %v697_v32 = vadd.f32 %v1538_v24, %v596_v30  ;;  %v713_v33 = vadd.f32 %v1538_v24, %v660_v31  ;;  %v795_v38 = vmax.f32 %v696_v23, 0.0  ;;  %v811_v39 = vmax.f32 %v712_v25, 0.0 }
 0x10f   : > { %v798_v36 = vmax.f32 %v699_v28, 0.0  ;;  %v814_v37 = vmax.f32 %v715_v29, 0.0 }
 0x110   : > { %v796_v40 = vmax.f32 %v697_v32, 0.0  ;;  %v812_v41 = vmax.f32 %v713_v33, 0.0 }
 0x111   : > { %v1220_v42 = vpack.c.bf16 %v798_v36, %v797_v34  ;;  %v1260_v43 = vpack.c.bf16 %v814_v37, %v813_v35 }
 0x112   : > { %v1215_v44 = vpack.c.bf16 %v796_v40, %v795_v38  ;;  %v1255_v45 = vpack.c.bf16 %v812_v41, %v811_v39  ;;  %v1341_v46 = vpop.f32.mrb[12].mxu0  ;;  %v1357_v47 = vpop.f32.mrb[12].mxu1 }
 0x113   : > { %1276 = vst [vmem:[%s1553_s17 + $0x28] sm:$0xff] %v1220_v42   ;;  %1284 = vst [vmem:[%s1553_s17 + $0x68] sm:$0xff] %v1260_v43   ;;  %v702_v48 = vadd.f32 %v1341_v46, %v1538_v24  ;;  %v718_v49 = vadd.f32 %v1357_v47, %v1538_v24  ;;  %v609_v50 = vpop.f32.mrb[13].mxu0  ;;  %v673_v51 = vpop.f32.mrb[13].mxu1 }
 0x114   : > { %1275 = vst [vmem:[%s1553_s17 + $0x20] sm:$0xff] %v1215_v44   ;;  %1283 = vst [vmem:[%s1553_s17 + $0x60] sm:$0xff] %v1255_v45   ;;  %v700_v52 = vadd.f32 %v1538_v24, %v609_v50  ;;  %v716_v53 = vadd.f32 %v1538_v24, %v673_v51  ;;  %v1342_v54 = vpop.f32.mrb[14].mxu0  ;;  %v1358_v55 = vpop.f32.mrb[14].mxu1 }
 0x115   : > { %v703_v56 = vadd.f32 %v1342_v54, %v1538_v24  ;;  %v719_v57 = vadd.f32 %v1358_v55, %v1538_v24  ;;  %v612_v58 = vpop.f32.mrb[15].mxu0  ;;  %v676_v59 = vpop.f32.mrb[15].mxu1  ;;  %v801_v62 = vmax.f32 %v702_v48, 0.0  ;;  %v817_v63 = vmax.f32 %v718_v49, 0.0 }
 0x116   : > { %v701_v60 = vadd.f32 %v1538_v24, %v612_v58  ;;  %v717_v61 = vadd.f32 %v1538_v24, %v676_v59  ;;  %v799_v2 = vmax.f32 %v700_v52, 0.0  ;;  %v815_v3 = vmax.f32 %v716_v53, 0.0 }
 0x117   : > { %v802_v0 = vmax.f32 %v703_v56, 0.0  ;;  %v818_v1 = vmax.f32 %v719_v57, 0.0 }
 0x118   : > { %v800_v4 = vmax.f32 %v701_v60, 0.0  ;;  %v816_v5 = vmax.f32 %v717_v61, 0.0 }
 0x119   : > { %v1230_v6 = vpack.c.bf16 %v802_v0, %v801_v62  ;;  %v1270_v7 = vpack.c.bf16 %v818_v1, %v817_v63 }
 0x11a   : > { %v1225_v8 = vpack.c.bf16 %v800_v4, %v799_v2  ;;  %v1265_v9 = vpack.c.bf16 %v816_v5, %v815_v3 }
 0x11b   : > { %1278 = vst [vmem:[%s1553_s17 + $0x38] sm:$0xff] %v1230_v6   ;;  %1286 = vst [vmem:[%s1553_s17 + $0x78] sm:$0xff] %v1270_v7  }
 0x11c   : > { %1277 = vst [vmem:[%s1553_s17 + $0x30] sm:$0xff] %v1225_v8   ;;  %1285 = vst [vmem:[%s1553_s17 + $0x70] sm:$0xff] %v1265_v9  }
 0x11d PF: > { %s13_s14 = sadd.s32 1, %s1445_s14   ;;  %s1608_s12 = smov %s1441_s13 }
 0x11e   : > { %p10_p5 = scmp.ge.s32.totalorder %s13_s14, 4   ;;  %s1609_s13 = smov %s1611_s15 }
 0x120   :  { %12 = sbr.rel (!%p10_p5) target bundleno = 2 (0x2), region = 76 }

// kernel: bottle_top_pallas.4
= control target key start
LH: loop header
LB: loop body
LE: loop exit
PB: predicated region body
PF: predicated region fallthrough
CT: control target
= control target key end

     0   :  { %s3336_s12 = smov 0   ;;  %s3842_s0 = inlined_call_operand.vmem [shape: bf16[2,4,100,128], index: 0, kind: input, shape index: {}]   ;;  %s3843_s1 = inlined_call_operand.vmem [shape: bf16[9,128,128], index: 1, kind: input, shape index: {}]   ;;  %s3844_s2 = inlined_call_operand.vmem [shape: f32[1,128], index: 2, kind: input, shape index: {}]   ;;  %s3845_s3 = inlined_call_operand.vmem [shape: bf16[2,80,128], index: 3, kind: output, shape index: {}]  }
   0x1 LB: > { %s2354_s13 = sadd.s32 4294967295, %s3312_s12   ;;  %p2358_p0 = scmp.ge.s32.totalorder %s3312_s12, 1  ;;  %s3312_s12 = sphi %s3336_s12, %s13_s12  }
   0x2   : > { %p137_p1 = scmp.lt.s32.totalorder %s3312_s12, 3 }
   0x4   : > { %p138_p2 = pnand %p2358_p0, %p137_p1 }
   0x5   : > { %v3184_v0 = vld [vmem:[%s3843_s1] sm:$0xff] (!%p138_p2)   ;;  %v3314_v1 = vmov (!%p138_p2), 0.0   ;;  %v3186_v3 = vld [vmem:[%s3843_s1 + $0x8] sm:$0xff] (!%p138_p2)   ;;  %vm3315_vm0 = vmmov (!%p138_p2), 0   ;;  %p161_p3 = scmp.lt.s32.totalorder (!%p138_p2), %s2354_s13, 1  ;;  %v3188_v5 = vld [vmem:[%s3843_s1 + $0x10] sm:$0xff] (!%p138_p2)  }
   0x6   : > { %141 = sbr.rel (%p138_p2) target bundleno = 437 (0x1b5), region = 32  ;;  %2832 = vmatprep.subr.bf16.mxu0 (!%p138_p2), %v3314_v1  ;;  %2868 = vmatprep.subr.bf16.mxu1 (!%p138_p2), %v3314_v1  ;;  %v3185_v2 = vld [vmem:[%s3843_s1 + $0x40] sm:$0xff] (!%p138_p2)   ;;  %v3187_v4 = vld [vmem:[%s3843_s1 + $0x48] sm:$0xff] (!%p138_p2)   ;;  %v3189_v6 = vld [vmem:[%s3843_s1 + $0x50] sm:$0xff] (!%p138_p2)   ;;  %vm624_vm1 = vsmask.f32 (!%p138_p2), 7424 }
   0x7   : > { %2833 = vmatpush3.bf16.msra.mxu0 (!%p138_p2), %v3184_v0  ;;  %2848 = vmatprep.mubr.msk.bf16.mxu0 (!%p138_p2), %vm3315_vm0, %v3314_v1  ;;  %v3190_v7 = vld [vmem:[%s3843_s1 + $0x18] sm:$0xff] (!%p138_p2)   ;;  %v3192_v9 = vld [vmem:[%s3843_s1 + $0x20] sm:$0xff] (!%p138_p2)   ;;  %v3194_v11 = vld [vmem:[%s3843_s1 + $0x28] sm:$0xff] (!%p138_p2)   ;;  %vm1555_vm2 = vcmask (!%p138_p2), 1046528   ;;  %vm2002_vm3 = vsmask.f32 (!%p138_p2), 6400 }
   0x8   : > { %2869 = vmatpush3.bf16.msra.mxu1 (!%p138_p2), %v3185_v2  ;;  %2834 = vmatprep.subr.bf16.mxu0 (!%p138_p2), %v3314_v1  ;;  %v3191_v8 = vld [vmem:[%s3843_s1 + $0x58] sm:$0xff] (!%p138_p2)   ;;  %v3193_v10 = vld [vmem:[%s3843_s1 + $0x60] sm:$0xff] (!%p138_p2)   ;;  %v3195_v12 = vld [vmem:[%s3843_s1 + $0x68] sm:$0xff] (!%p138_p2)  }
   0x9   : > { %2870 = vmatprep.subr.bf16.mxu1 (!%p138_p2), %v3314_v1  ;;  %2884 = vmatprep.mubr.msk.bf16.mxu1 (!%p138_p2), %vm3315_vm0, %v3314_v1  ;;  %v3196_v13 = vld [vmem:[%s3843_s1 + $0x30] sm:$0xff] (!%p138_p2)   ;;  %v3198_v15 = vld [vmem:[%s3843_s1 + $0x38] sm:$0xff] (!%p138_p2)   ;;  %v3202_v19 = vld [vmem:[%s3843_s1 + $0x80] sm:$0xff] (!%p138_p2)  }
   0xa   : > { %v3197_v14 = vld [vmem:[%s3843_s1 + $0x70] sm:$0xff] (!%p138_p2)   ;;  %v3199_v16 = vld [vmem:[%s3843_s1 + $0x78] sm:$0xff] (!%p138_p2)   ;;  %v3206_v20 = vld [vmem:[%s3843_s1 + $0xc0] sm:$0xff] (!%p138_p2)  }
   0xb   : > { %2835 = vmatpush3.bf16.msra.mxu0 (!%p138_p2), %v3186_v3  ;;  %v3203_v21 = vld [vmem:[%s3843_s1 + $0x88] sm:$0xff] (!%p138_p2)   ;;  %v3207_v25 = vld [vmem:[%s3843_s1 + $0x90] sm:$0xff] (!%p138_p2)   ;;  %v3211_v27 = vld [vmem:[%s3843_s1 + $0x98] sm:$0xff] (!%p138_p2)  }
   0xc   : > { %2871 = vmatpush3.bf16.msra.mxu1 (!%p138_p2), %v3187_v4  ;;  %2836 = vmatprep.subr.bf16.mxu0 (!%p138_p2), %v3314_v1  ;;  %v3208_v23 = vld [vmem:[%s3843_s1 + $0xc8] sm:$0xff] (!%p138_p2)   ;;  %v3212_v26 = vld [vmem:[%s3843_s1 + $0xd0] sm:$0xff] (!%p138_p2)   ;;  %v3214_v29 = vld [vmem:[%s3843_s1 + $0xd8] sm:$0xff] (!%p138_p2)  }
   0xd   : > { %s3847_s13 = smov (!%p161_p3, %s2354_s13), 1  ;;  %2872 = vmatprep.subr.bf16.mxu1 %v3314_v1  ;;  %v3213_v31 = vld [vmem:[%s3843_s1 + $0xa0] sm:$0xff]   ;;  %v3218_v33 = vld [vmem:[%s3843_s1 + $0xa8] sm:$0xff]   ;;  %v3220_v38 = vld [vmem:[%s3843_s1 + $0xb0] sm:$0xff]  }
   0xe   : > { %s3172_s30 = smul.u32 208, %s3847_s13  ;;  %v3217_v32 = vld [vmem:[%s3843_s1 + $0xe0] sm:$0xff]   ;;  %v3219_v35 = vld [vmem:[%s3843_s1 + $0xe8] sm:$0xff]   ;;  %v3223_v39 = vld [vmem:[%s3843_s1 + $0xf0] sm:$0xff]  }
   0xf   : > { %2837 = vmatpush3.bf16.msra.mxu0 %v3188_v5  ;;  %v3224_v43 = vld [vmem:[%s3843_s1 + $0xb8] sm:$0xff]   ;;  %v3229_v53 = vld [vmem:[%s3843_s1 + $0x100] sm:$0xff]   ;;  %v3230_v58 = vld [vmem:[%s3843_s1 + $0x108] sm:$0xff]   ;;  %s3173_s18 = smul.u32 40, %s3847_s13 }
  0x10   : > { %2873 = vmatpush3.bf16.msra.mxu1 %v3189_v6  ;;  %2838 = vmatprep.subr.bf16.mxu0 %v3314_v1  ;;  %s3393_s10 = scalar_lea.vmem %s3842_s0, %s3172_s30  ;;  %v3225_v44 = vld [vmem:[%s3843_s1 + $0xf8] sm:$0xff]   ;;  %v3233_v57 = vld [vmem:[%s3843_s1 + $0x140] sm:$0xff]   ;;  %v3234_v63 = vld [vmem:[%s3843_s1 + $0x110] sm:$0xff]  }
  0x11   : > { %2874 = vmatprep.subr.bf16.mxu1 %v3314_v1  ;;  %v3200_v17 = vld [vmem:[%s3393_s10] sm:$0xff]   ;;  %v3201_v18 = vld [vmem:[%s3393_s10 + $0x34] sm:$0xff]   ;;  %v3204_v22 = vld [vmem:[%s3393_s10 + $0x8] sm:$0xff]   ;;  %s3828_s21 = scalar_lea.vmem %s3845_s3, %s3173_s18 }
  0x12   : > { %v3205_v24 = vld [vmem:[%s3393_s10 + $0x3c] sm:$0xff]   ;;  %v3209_v28 = vld [vmem:[%s3393_s10 + $0x10] sm:$0xff]   ;;  %v3210_v30 = vld [vmem:[%s3393_s10 + $0x44] sm:$0xff]  }
  0x13   : > { %2839 = vmatpush3.bf16.msra.mxu0 %v3190_v7  ;;  %v3215_v34 = vld [vmem:[%s3393_s10 + $0x18] sm:$0xff]   ;;  %v3216_v36 = vld [vmem:[%s3393_s10 + $0x4c] sm:$0xff]   ;;  %v3226_v37 = vld [vmem:[%s3393_s10] sm:$0xff]  }
  0x14   : > { %2875 = vmatpush3.bf16.msra.mxu1 %v3191_v8  ;;  %2840 = vmatprep.subr.bf16.mxu0 %v3314_v1  ;;  %v3227_v40 = vld [vmem:[%s3393_s10 + $0x8] sm:$0xff]   ;;  %v628_v41 = vshll.u32 %v3226_v37, 16  ;;  %v3221_v42 = vld [vmem:[%s3393_s10 + $0x20] sm:$0xff]   ;;  %v3222_v45 = vld [vmem:[%s3393_s10 + $0x54] sm:$0xff]   ;;  %v626_v46 = vshrl.u32 %v3226_v37, 16 }
  0x15   : > { %2876 = vmatprep.subr.bf16.mxu1 %v3314_v1  ;;  %v633_v48 = vshll.u32 %v3227_v40, 16  ;;  %v3231_v49 = vld [vmem:[%s3393_s10 + $0x10] sm:$0xff]   ;;  %v3228_v52 = vld [vmem:[%s3393_s10 + $0x68] sm:$0xff]   ;;  %v637_v54 = vshrl.u32 %v3227_v40, 16  ;;  %v3236_v60 = vld [vmem:[%s3393_s10 + $0x18] sm:$0xff]  }
  0x16   : > { %v630_v47 = vrot.slane %v628_v41, 1  ;;  %v641_v55 = vshll.u32 %v3231_v49, 16  ;;  %v3232_v62 = vld [vmem:[%s3393_s10 + $0x70] sm:$0xff]   ;;  %v3235_v0 = vld [vmem:[%s3843_s1 + $0x148] sm:$0xff]   ;;  %v645_v2 = vshrl.u32 %v3231_v49, 16  ;;  %v649_v3 = vshll.u32 %v3236_v60, 16 }
  0x17   : > { %2841 = vmatpush3.bf16.msra.mxu0 %v3192_v9  ;;  %v635_v51 = vrot.slane %v633_v48, 1  ;;  %v3239_v5 = vld [vmem:[%s3843_s1 + $0x150] sm:$0xff]   ;;  %v3242_v6 = vld [vmem:[%s3393_s10 + $0x20] sm:$0xff]   ;;  %v3238_v9 = vld [vmem:[%s3843_s1 + $0x118] sm:$0xff]  }
  0x18   : > { %2877 = vmatpush3.bf16.msra.mxu1 %v3193_v10  ;;  %2842 = vmatprep.subr.bf16.mxu0 %v3314_v1  ;;  %v631_v50 = vor.u32 %v630_v47, %v626_v46  ;;  %v643_v59 = vrot.slane %v641_v55, 1  ;;  %v651_v8 = vrot.slane %v649_v3, 1  ;;  %v3241_v10 = vld [vmem:[%s3843_s1 + $0x158] sm:$0xff]   ;;  %v3260_v48 = vld [vmem:[%s3843_s1 + $0x1c0] sm:$0xff]   ;;  %v3257_v49 = vld [vmem:[%s3843_s1 + $0x188] sm:$0xff]  }
  0x19   : > { %2878 = vmatprep.subr.bf16.mxu1 %v3314_v1  ;;  %v639_v61 = vor.u32 %v637_v54, %v635_v51  ;;  %v3258_v54 = vld [vmem:[%s3393_s10 + $0xa4] sm:$0xff]   ;;  %v3261_v55 = vld [vmem:[%s3843_s1 + $0x190] sm:$0xff]  }
  0x1a   : > { %v636_v56 = vsel %vm624_vm1, %v631_v50, %v635_v51  ;;  %v647_v7 = vor.u32 %v645_v2, %v643_v59  ;;  %v3263_v2 = vld [vmem:[%s3393_s10 + $0xac] sm:$0xff]   ;;  %v3267_v3 = vld [vmem:[%s3843_s1 + $0x1a0] sm:$0xff]  }
  0x1b   : > { %2843 = vmatpush3.bf16.msra.mxu0 %v3194_v11  ;;  %v644_v4 = vsel %vm624_vm1, %v639_v61, %v643_v59  ;;  %v3237_v11 = vld [vmem:[%s3393_s10 + $0x78] sm:$0xff]   ;;  %v3266_v59 = vld [vmem:[%s3843_s1 + $0x1d0] sm:$0xff]  }
  0x1c   : > { %2879 = vmatpush3.bf16.msra.mxu1 %v3195_v12  ;;  %2844 = vmatprep.subr.bf16.mxu0 %v3314_v1  ;;  %v657_v12 = vshll.u32 %v3242_v6, 16 }
  0x1d   : > { %2880 = vmatprep.subr.bf16.mxu1 %v3314_v1 }
  0x1f   : > { %2845 = vmatpush3.bf16.msra.mxu0 %v3196_v13  ;;  %v652_v13 = vsel %vm624_vm1, %v647_v7, %v651_v8  ;;  %v3271_v7 = vld [vmem:[%s3843_s1 + $0x1e0] sm:$0xff]  }
  0x20   : > { %2881 = vmatpush3.bf16.msra.mxu1 %v3197_v14  ;;  %2846 = vmatprep.subr.bf16.mxu0 %v3314_v1  ;;  %v3240_v14 = vld [vmem:[%s3843_s1 + $0x120] sm:$0xff]  }
  0x21   : > { %2882 = vmatprep.subr.bf16.mxu1 %v3314_v1 }
  0x23   : > { %2847 = vmatpush3.bf16.msra.mxu0 %v3198_v15  ;;  %v653_v15 = vshrl.u32 %v3236_v60, 16  ;;  %v3265_v60 = vld [vmem:[%s3843_s1 + $0x198] sm:$0xff]  }
  0x24   : > { %2883 = vmatpush3.bf16.msra.mxu1 %v3199_v16  ;;  %2904 = vmatprep.subr.bf16.mxu0 %v3314_v1  ;;  %v3244_v16 = vld [vmem:[%s3843_s1 + $0x160] sm:$0xff]  }
  0x25   : > { %2940 = vmatprep.subr.bf16.mxu1 %v3314_v1 }
  0x26   : > { %2849 = vmatmul.mubr.bf16.vlgmr.msra.gmra.mrb[0].mxu0 %v3200_v17  ;;  %v659_v17 = vrot.slane %v657_v12, 1  ;;  %v3273_v12 = vld [vmem:[%s3843_s1 + $0x1e8] sm:$0xff]  }
  0x27   : > { %2885 = vmatmul.mubr.bf16.vlgmr.msra.gmra.mrb[0].mxu1 %v3201_v18  ;;  %2905 = vmatpush3.bf16.msra.mxu0 %v3202_v19  ;;  %v3245_v18 = vld [vmem:[%s3843_s1 + $0x128] sm:$0xff]   ;;  %v655_v19 = vor.u32 %v653_v15, %v651_v8  ;;  %v3274_v15 = vld [vmem:[%s3843_s1 + $0x1b0] sm:$0xff]  }
  0x28   : > { %2906 = vmatprep.subr.bf16.mxu0 %v3314_v1  ;;  %2852 = vmatprep.mubr.msk.bf16.mxu0 %vm3315_vm0, %v3314_v1  ;;  %v3272_v8 = vld [vmem:[%s3843_s1 + $0x1a8] sm:$0xff]  }
  0x29   : > { %2888 = vmatprep.mubr.msk.bf16.mxu1 %vm3315_vm0, %v3314_v1  ;;  %2941 = vmatpush3.bf16.msra.mxu1 %v3206_v20  ;;  %v3248_v20 = vld [vmem:[%s3393_s10 + $0x28] ss:$0 sps:$4 sm:$0xff]  }
  0x2a   : > { %2942 = vmatprep.subr.bf16.mxu1 %v3314_v1 }
  0x2b   : > { %2907 = vmatpush3.bf16.msra.mxu0 %v3203_v21  ;;  %v3246_v21 = vld [vmem:[%s3843_s1 + $0x168] sm:$0xff]  }
  0x2c   : > { %2908 = vmatprep.subr.bf16.mxu0 %v3314_v1 }
  0x2d   : > { %2943 = vmatpush3.bf16.msra.mxu1 %v3208_v23  ;;  %v661_v23 = vshrl.u32 %v3242_v6, 16 }
  0x2e   : > { %2853 = vmatmul.mubr.bf16.gmra.mrb[4].mxu0 %v3204_v22  ;;  %2944 = vmatprep.subr.bf16.mxu1 %v3314_v1  ;;  %v3243_v22 = vld [vmem:[%s3393_s10 + $0x80] sm:$0xff]  }
  0x2f   : > { %2889 = vmatmul.mubr.bf16.gmra.mrb[4].mxu1 %v3205_v24  ;;  %2909 = vmatpush3.bf16.msra.mxu0 %v3207_v25  ;;  %v660_v24 = vsel %vm624_vm1, %v655_v19, %v659_v17  ;;  %v3247_v25 = vld [vmem:[%s3843_s1 + $0x130] sm:$0xff]  }
  0x30   : > { %2856 = vmatprep.mubr.msk.bf16.mxu0 %vm3315_vm0, %v3314_v1  ;;  %2892 = vmatprep.mubr.msk.bf16.mxu1 %vm3315_vm0, %v3314_v1 }
  0x31   : > { %2910 = vmatprep.subr.bf16.mxu0 %v3314_v1  ;;  %2945 = vmatpush3.bf16.msra.mxu1 %v3212_v26  ;;  %v665_v26 = vshll.u32 %v3248_v20, 16 }
  0x32   : > { %2946 = vmatprep.subr.bf16.mxu1 %v3314_v1 }
  0x33   : > { %2911 = vmatpush3.bf16.msra.mxu0 %v3211_v27  ;;  %v3254_v27 = vld [vmem:[%s3393_s10 + $0x68] sm:$0xff]  }
  0x34   : > { %2912 = vmatprep.subr.bf16.mxu0 %v3314_v1  ;;  %v1300_v37 = vshrl.u32 %v3254_v27, 16 }
  0x35   : > { %2947 = vmatpush3.bf16.msra.mxu1 %v3214_v29  ;;  %v663_v29 = vor.u32 %v661_v23, %v659_v17  ;;  %v3275_v23 = vld [vmem:[%s3393_s10 + $0xbc] sm:$0xff]  }
  0x36   : > { %2857 = vmatmul.mubr.bf16.gmra.mrb[8].mxu0 %v3209_v28  ;;  %2948 = vmatprep.subr.bf16.mxu1 %v3314_v1  ;;  %v3250_v28 = vld [vmem:[%s3843_s1 + $0x170] sm:$0xff]  }
  0x37   : > { %2893 = vmatmul.mubr.bf16.gmra.mrb[8].mxu1 %v3210_v30  ;;  %2913 = vmatpush3.bf16.msra.mxu0 %v3213_v31  ;;  %v667_v30 = vrot.slane %v665_v26, 1  ;;  %v3251_v31 = vld [vmem:[%s3843_s1 + $0x138] sm:$0xff]  }
  0x38   : > { %2860 = vmatprep.mubr.msk.bf16.mxu0 %vm3315_vm0, %v3314_v1  ;;  %2896 = vmatprep.mubr.msk.bf16.mxu1 %vm3315_vm0, %v3314_v1 }
  0x39   : > { %2914 = vmatprep.subr.bf16.mxu0 %v3314_v1  ;;  %2949 = vmatpush3.bf16.msra.mxu1 %v3217_v32  ;;  %v3255_v32 = vld [vmem:[%s3393_s10 + $0x70] sm:$0xff]  }
  0x3a   : > { %2950 = vmatprep.subr.bf16.mxu1 %v3314_v1  ;;  %v1311_v46 = vshrl.u32 %v3255_v32, 16 }
  0x3b   : > { %2915 = vmatpush3.bf16.msra.mxu0 %v3218_v33  ;;  %v1302_v33 = vshll.u32 %v3254_v27, 16  ;;  %v3282_v27 = vld [vmem:[%s3393_s10 + $0x38] sm:$0xff]  }
  0x3c   : > { %2916 = vmatprep.subr.bf16.mxu0 %v3314_v1 }
  0x3d   : > { %2951 = vmatpush3.bf16.msra.mxu1 %v3219_v35  ;;  %v668_v35 = vsel %vm624_vm1, %v663_v29, %v667_v30 }
  0x3e   : > { %2861 = vmatmul.mubr.bf16.gmra.mrb[12].mxu0 %v3215_v34  ;;  %2952 = vmatprep.subr.bf16.mxu1 %v3314_v1  ;;  %v3252_v34 = vld [vmem:[%s3843_s1 + $0x178] sm:$0xff]  }
  0x3f   : > { %2897 = vmatmul.mubr.bf16.gmra.mrb[12].mxu1 %v3216_v36  ;;  %2864 = vmatprep.mubr.msk.bf16.mxu0 %vm3315_vm0, %v3314_v1  ;;  %v3249_v36 = vld [vmem:[%s3393_s10 + $0x88] sm:$0xff]  }
  0x40   : > { %2900 = vmatprep.mubr.msk.bf16.mxu1 %vm3315_vm0, %v3314_v1  ;;  %2917 = vmatpush3.bf16.msra.mxu0 %v3220_v38  ;;  %v1304_v38 = vrot.slane %v1302_v33, 1 }
  0x41   : > { %2953 = vmatpush3.bf16.msra.mxu1 %v3223_v39  ;;  %2918 = vmatprep.subr.bf16.mxu0 %v3314_v1  ;;  %v1307_v39 = vshll.u32 %v3255_v32, 16 }
  0x42   : > { %2954 = vmatprep.subr.bf16.mxu1 %v3314_v1  ;;  %v1305_v40 = vor.u32 %v1304_v38, %v1300_v37  ;;  %v3287_v37 = vld [vmem:[%s3393_s10 + $0x48] sm:$0xff]  }
  0x43   : > { %v1309_v41 = vrot.slane %v1307_v39, 1  ;;  %v3285_v38 = vld [vmem:[%s3843_s1 + $0x208] sm:$0xff]  }
  0x44   : > { %2919 = vmatpush3.bf16.msra.mxu0 %v3224_v43  ;;  %v3253_v43 = vld [vmem:[%s3393_s10 + $0x9c] sm:$0xff]  }
  0x45   : > { %2955 = vmatpush3.bf16.msra.mxu1 %v3225_v44  ;;  %2976 = vmatprep.subr.bf16.mxu0 %v3314_v1  ;;  %v3256_v44 = vld [vmem:[%s3843_s1 + $0x180] sm:$0xff]   ;;  %v1313_v50 = vor.u32 %v1311_v46, %v1309_v41 }
  0x46   : > { %2865 = vmatmul.mubr.bf16.gmra.mrb[16].mxu0 %v3221_v42  ;;  %3012 = vmatprep.subr.bf16.mxu1 %v3314_v1  ;;  %v3259_v42 = vld [vmem:[%s3393_s10 + $0x78] sm:$0xff]  }
  0x47   : > { %2901 = vmatmul.mubr.bf16.gmra.mrb[16].mxu1 %v3222_v45  ;;  %2920 = vmatprep.mubr.msk.bf16.mxu0 %vm3315_vm0, %v3314_v1  ;;  %v1310_v45 = vsel %vm624_vm1, %v1305_v40, %v1309_v41  ;;  %v1315_v47 = vshll.u32 %v3259_v42, 16  ;;  %v1782_v40 = vrot.slane %v3287_v37, 1 }
  0x48   : > { %2956 = vmatprep.mubr.msk.bf16.mxu1 %vm3315_vm0, %v3314_v1 }
  0x49   : > { %v1317_v51 = vrot.slane %v1315_v47, 1  ;;  %v3291_v47 = vld [vmem:[%s3843_s1 + $0x218] sm:$0xff]  }
  0x4e   : > { %2921 = vmatmul.mubr.bf16.vlgmr.msra.gmra.mrb[20].mxu0 %v636_v56  ;;  %v1318_v56 = vsel %vm624_vm1, %v1313_v50, %v1317_v51  ;;  %v3292_v50 = vld [vmem:[%s3843_s1 + $0x220] sm:$0xff]  }
  0x4f   : > { %2957 = vmatmul.mubr.bf16.vlgmr.msra.gmra.mrb[20].mxu1 %v3228_v52  ;;  %2977 = vmatpush3.bf16.msra.mxu0 %v3229_v53  ;;  %v3264_v52 = vld [vmem:[%s3393_s10 + $0x80] sm:$0xff]   ;;  %v3262_v53 = vld [vmem:[%s3843_s1 + $0x1c8] sm:$0xff]  }
  0x50   : > { %2978 = vmatprep.subr.bf16.mxu0 %v3314_v1  ;;  %2924 = vmatprep.mubr.msk.bf16.mxu0 %vm3315_vm0, %v3314_v1 }
  0x51   : > { %2960 = vmatprep.mubr.msk.bf16.mxu1 %vm3315_vm0, %v3314_v1  ;;  %3013 = vmatpush3.bf16.msra.mxu1 %v3233_v57  ;;  %v1319_v57 = vshrl.u32 %v3259_v42, 16  ;;  %v3288_v42 = vld [vmem:[%s3843_s1 + $0x210] sm:$0xff]  }
  0x52   : > { %3014 = vmatprep.subr.bf16.mxu1 %v3314_v1 }
  0x53   : > { %2979 = vmatpush3.bf16.msra.mxu0 %v3230_v58  ;;  %v1323_v58 = vshll.u32 %v3264_v52, 16  ;;  %v1321_v61 = vor.u32 %v1319_v57, %v1317_v51  ;;  %v3293_v51 = vld [vmem:[%s3393_s10 + $0x24] sm:$0xff]   ;;  %v3297_v57 = vld [vmem:[%s3393_s10 + $0x2c] ss:$0 sps:$4 sm:$0xff]  }
  0x54   : > { %2980 = vmatprep.subr.bf16.mxu0 %v3314_v1 }
  0x55   : > { %3015 = vmatpush3.bf16.msra.mxu1 %v3235_v0  ;;  %v3268_v0 = vld [vmem:[%s3843_s1 + $0x1d8] sm:$0xff]  }
  0x56   : > { %2925 = vmatmul.mubr.bf16.gmra.mrb[24].mxu0 %v644_v4  ;;  %3016 = vmatprep.subr.bf16.mxu1 %v3314_v1 }
  0x57   : > { %2961 = vmatmul.mubr.bf16.gmra.mrb[24].mxu1 %v3232_v62  ;;  %2981 = vmatpush3.bf16.msra.mxu0 %v3234_v63  ;;  %v1325_v62 = vrot.slane %v1323_v58, 1  ;;  %v3270_v63 = vld [vmem:[%s3393_s10 + $0x88] sm:$0xff]   ;;  %v3298_v58 = vld [vmem:[%s3393_s10 + $0x60] ss:$0 sps:$4 sm:$0xff]  }
  0x58   : > { %2928 = vmatprep.mubr.msk.bf16.mxu0 %vm3315_vm0, %v3314_v1  ;;  %2964 = vmatprep.mubr.msk.bf16.mxu1 %vm3315_vm0, %v3314_v1  ;;  %v1331_v6 = vshll.u32 %v3270_v63, 16 }
  0x59   : > { %2982 = vmatprep.subr.bf16.mxu0 %v3314_v1  ;;  %3017 = vmatpush3.bf16.msra.mxu1 %v3239_v5  ;;  %v1326_v4 = vsel %vm624_vm1, %v1321_v61, %v1325_v62  ;;  %v1327_v5 = vshrl.u32 %v3264_v52, 16  ;;  %v3301_v61 = vld [vmem:[%s3393_s10 + $0xc] sm:$0xff]  }
  0x5a   : > { %3018 = vmatprep.subr.bf16.mxu1 %v3314_v1 }
  0x5b   : > { %2983 = vmatpush3.bf16.msra.mxu0 %v3238_v9  ;;  %v1329_v9 = vor.u32 %v1327_v5, %v1325_v62 }
  0x5c   : > { %2984 = vmatprep.subr.bf16.mxu0 %v3314_v1 }
  0x5d   : > { %3019 = vmatpush3.bf16.msra.mxu1 %v3241_v10  ;;  %v1333_v10 = vrot.slane %v1331_v6, 1 }
  0x5e   : > { %2929 = vmatmul.mubr.bf16.gmra.mrb[28].mxu0 %v652_v13  ;;  %3020 = vmatprep.subr.bf16.mxu1 %v3314_v1  ;;  %v3269_v13 = vld [vmem:[%s3393_s10 + $0xb4] sm:$0xff]  }
  0x5f   : > { %2965 = vmatmul.mubr.bf16.gmra.mrb[28].mxu1 %v3237_v11  ;;  %2985 = vmatpush3.bf16.msra.mxu0 %v3240_v14  ;;  %v3276_v11 = vld [vmem:[%s3393_s10 + $0x90] ss:$0 sps:$4 sm:$0xff]   ;;  %v1334_v14 = vsel %vm624_vm1, %v1329_v9, %v1333_v10  ;;  %v3299_v9 = vld [vmem:[%s3843_s1 + $0x238] sm:$0xff]  }
  0x60   : > { %2932 = vmatprep.mubr.msk.bf16.mxu0 %vm3315_vm0, %v3314_v1  ;;  %2968 = vmatprep.mubr.msk.bf16.mxu1 %vm3315_vm0, %v3314_v1  ;;  %v1339_v17 = vshll.u32 %v3276_v11, 16 }
  0x61   : > { %2986 = vmatprep.subr.bf16.mxu0 %v3314_v1  ;;  %3021 = vmatpush3.bf16.msra.mxu1 %v3244_v16  ;;  %v1335_v16 = vshrl.u32 %v3270_v63, 16  ;;  %v3296_v63 = vld [vmem:[%s3843_s1 + $0x230] sm:$0xff]  }
  0x62   : > { %3022 = vmatprep.subr.bf16.mxu1 %v3314_v1  ;;  %v1341_v20 = vrot.slane %v1339_v17, 1 }
  0x63   : > { %2987 = vmatpush3.bf16.msra.mxu0 %v3245_v18  ;;  %v3277_v18 = vld [vmem:[%s3843_s1 + $0x1f0] sm:$0xff]   ;;  %v1337_v19 = vor.u32 %v1335_v16, %v1333_v10 }
  0x64   : > { %2988 = vmatprep.subr.bf16.mxu0 %v3314_v1 }
  0x65   : > { %3023 = vmatpush3.bf16.msra.mxu1 %v3246_v21  ;;  %v3278_v21 = vld [vmem:[%s3843_s1 + $0x1b8] sm:$0xff]   ;;  %v1342_v26 = vsel %vm624_vm1, %v1337_v19, %v1341_v20 }
  0x66   : > { %2933 = vmatmul.mubr.bf16.gmra.mrb[32].mxu0 %v660_v24  ;;  %3024 = vmatprep.subr.bf16.mxu1 %v3314_v1  ;;  %v3280_v24 = vld [vmem:[%s3393_s10 + $0x4] sm:$0xff]   ;;  %v3304_v20 = vld [vmem:[%s3393_s10 + $0x14] sm:$0xff]  }
  0x67   : > { %2969 = vmatmul.mubr.bf16.gmra.mrb[32].mxu1 %v3243_v22  ;;  %2936 = vmatprep.mubr.msk.bf16.mxu0 %vm3315_vm0, %v3314_v1  ;;  %v3279_v22 = vld [vmem:[%s3843_s1 + $0x1f8] sm:$0xff]   ;;  %v1556_v29 = vrot.slane %v3280_v24, 1 }
  0x68   : > { %2972 = vmatprep.mubr.msk.bf16.mxu1 %vm3315_vm0, %v3314_v1  ;;  %2989 = vmatpush3.bf16.msra.mxu0 %v3247_v25  ;;  %v3281_v25 = vld [vmem:[%s3393_s10 + $0xc] sm:$0xff]  }
  0x69   : > { %3025 = vmatpush3.bf16.msra.mxu1 %v3250_v28  ;;  %2990 = vmatprep.subr.bf16.mxu0 %v3314_v1  ;;  %v3283_v28 = vld [vmem:[%s3393_s10 + $0x40] sm:$0xff]   ;;  %v1557_v30 = vrot.slane %v3281_v25, 1  ;;  %v3305_v25 = vld [vmem:[%s3393_s10 + $0x2c] ss:$0 sps:$4 sm:$0xff]  }
  0x6a   : > { %3026 = vmatprep.subr.bf16.mxu1 %v3314_v1  ;;  %v1780_v32 = vrot.slane %v3283_v28, 1  ;;  %v2021_v28 = vshrl.u32 %v3304_v20, 16 }
  0x6b   : > { %v1558_v33 = vsel %vm1555_vm2, %v1556_v29, %v1557_v30  ;;  %v2024_v29 = vshll.u32 %v3304_v20, 16 }
  0x6c   : > { %2991 = vmatpush3.bf16.msra.mxu0 %v3251_v31  ;;  %v1779_v31 = vrot.slane %v3282_v27, 1 }
  0x6d   : > { %3027 = vmatpush3.bf16.msra.mxu1 %v3252_v34  ;;  %3048 = vmatprep.subr.bf16.mxu0 %v3314_v1  ;;  %v3284_v34 = vld [vmem:[%s3843_s1 + $0x200] sm:$0xff]  }
  0x6e   : > { %2937 = vmatmul.mubr.bf16.gmra.mrb[36].mxu0 %v668_v35  ;;  %3084 = vmatprep.subr.bf16.mxu1 %v3314_v1  ;;  %v3286_v35 = vld [vmem:[%s3393_s10 + $0x14] sm:$0xff]  }
  0x6f   : > { %2973 = vmatmul.mubr.bf16.gmra.mrb[36].mxu1 %v3249_v36  ;;  %2992 = vmatprep.mubr.msk.bf16.mxu0 %vm3315_vm0, %v3314_v1  ;;  %v1781_v36 = vsel %vm1555_vm2, %v1779_v31, %v1780_v32  ;;  %v1559_v39 = vrot.slane %v3286_v35, 1  ;;  %v2023_v35 = vrot.slane %v2021_v28, 1 }
  0x70   : > { %3028 = vmatprep.mubr.msk.bf16.mxu1 %vm3315_vm0, %v3314_v1 }
  0x71   : > { %v1560_v41 = vsel %vm1555_vm2, %v1557_v30, %v1559_v39 }
  0x76   : > { %2993 = vmatmul.mubr.bf16.vlgmr.msra.gmra.mrb[40].mxu0 %v3253_v43  ;;  %v3289_v43 = vld [vmem:[%s3393_s10 + $0x1c] sm:$0xff]  }
  0x77   : > { %3029 = vmatmul.mubr.bf16.vlgmr.msra.gmra.mrb[40].mxu1 %v1310_v45  ;;  %3049 = vmatpush3.bf16.msra.mxu0 %v3256_v44  ;;  %v1783_v44 = vsel %vm1555_vm2, %v1780_v32, %v1782_v40  ;;  %v3290_v45 = vld [vmem:[%s3393_s10 + $0x50] sm:$0xff]   ;;  %v1561_v46 = vrot.slane %v3289_v43, 1  ;;  %v2048_v32 = vshrl.u32 %v3305_v25, 16 }
  0x78   : > { %3050 = vmatprep.subr.bf16.mxu0 %v3314_v1  ;;  %2996 = vmatprep.mubr.msk.bf16.mxu0 %vm3315_vm0, %v3314_v1 }
  0x79   : > { %3032 = vmatprep.mubr.msk.bf16.mxu1 %vm3315_vm0, %v3314_v1  ;;  %3085 = vmatpush3.bf16.msra.mxu1 %v3260_v48  ;;  %v1784_v48 = vrot.slane %v3290_v45, 1 }
  0x7a   : > { %3086 = vmatprep.subr.bf16.mxu1 %v3314_v1 }
  0x7b   : > { %3051 = vmatpush3.bf16.msra.mxu0 %v3257_v49  ;;  %v1562_v49 = vsel %vm1555_vm2, %v1559_v39, %v1561_v46  ;;  %v1785_v52 = vsel %vm1555_vm2, %v1782_v40, %v1784_v48 }
  0x7c   : > { %3052 = vmatprep.subr.bf16.mxu0 %v3314_v1 }
  0x7d   : > { %3087 = vmatpush3.bf16.msra.mxu1 %v3262_v53  ;;  %v3294_v53 = vld [vmem:[%s3393_s10 + $0x58] sm:$0xff]  }
  0x7e   : > { %2997 = vmatmul.mubr.bf16.gmra.mrb[44].mxu0 %v3258_v54  ;;  %3088 = vmatprep.subr.bf16.mxu1 %v3314_v1  ;;  %v1563_v54 = vrot.slane %v3293_v51, 1 }
  0x7f   : > { %3033 = vmatmul.mubr.bf16.gmra.mrb[44].mxu1 %v1318_v56  ;;  %3053 = vmatpush3.bf16.msra.mxu0 %v3261_v55  ;;  %v3295_v55 = vld [vmem:[%s3843_s1 + $0x228] sm:$0xff]   ;;  %v1786_v56 = vrot.slane %v3294_v53, 1 }
  0x80   : > { %3000 = vmatprep.mubr.msk.bf16.mxu0 %vm3315_vm0, %v3314_v1  ;;  %3036 = vmatprep.mubr.msk.bf16.mxu1 %vm3315_vm0, %v3314_v1 }
  0x81   : > { %3054 = vmatprep.subr.bf16.mxu0 %v3314_v1  ;;  %3089 = vmatpush3.bf16.msra.mxu1 %v3266_v59  ;;  %v1564_v59 = vsel %vm1555_vm2, %v1561_v46, %v1563_v54  ;;  %v1787_v62 = vsel %vm1555_vm2, %v1784_v48, %v1786_v56 }
  0x82   : > { %3090 = vmatprep.subr.bf16.mxu1 %v3314_v1 }
  0x83   : > { %3055 = vmatpush3.bf16.msra.mxu0 %v3265_v60  ;;  %v3300_v60 = vld [vmem:[%s3393_s10 + $0x4] sm:$0xff]  }
  0x84   : > { %3056 = vmatprep.subr.bf16.mxu0 %v3314_v1  ;;  %v2004_v5 = vshrl.u32 %v3300_v60, 16  ;;  %v2007_v6 = vshll.u32 %v3300_v60, 16 }
  0x85   : > { %3091 = vmatpush3.bf16.msra.mxu1 %v3268_v0  ;;  %v3302_v0 = vld [vmem:[%s3393_s10 + $0x1c] sm:$0xff]  }
  0x86   : > { %3001 = vmatmul.mubr.bf16.gmra.mrb[48].mxu0 %v3263_v2  ;;  %3092 = vmatprep.subr.bf16.mxu1 %v3314_v1  ;;  %v3303_v2 = vld [vmem:[%s3393_s10 + $0x24] sm:$0xff]   ;;  %v2030_v10 = vshrl.u32 %v3302_v0, 16  ;;  %v2033_v11 = vshll.u32 %v3302_v0, 16  ;;  %v2006_v16 = vrot.slane %v2004_v5, 1  ;;  %v2009_v17 = vrot.slane %v2007_v6, 2 }
  0x87   : > { %3037 = vmatmul.mubr.bf16.gmra.mrb[48].mxu1 %v1326_v4  ;;  %3057 = vmatpush3.bf16.msra.mxu0 %v3267_v3  ;;  %v1565_v3 = vrot.slane %v3297_v57, 1  ;;  %v1788_v4 = vrot.slane %v3298_v58, 1 }
  0x88   : > { %3004 = vmatprep.mubr.msk.bf16.mxu0 %vm3315_vm0, %v3314_v1  ;;  %3040 = vmatprep.mubr.msk.bf16.mxu1 %vm3315_vm0, %v3314_v1 }
  0x89   : > { %3058 = vmatprep.subr.bf16.mxu0 %v3314_v1  ;;  %3093 = vmatpush3.bf16.msra.mxu1 %v3271_v7  ;;  %v2012_v7 = vshrl.u32 %v3301_v61, 16 }
  0x8a   : > { %3094 = vmatprep.subr.bf16.mxu1 %v3314_v1 }
  0x8b   : > { %3059 = vmatpush3.bf16.msra.mxu0 %v3272_v8  ;;  %v2015_v8 = vshll.u32 %v3301_v61, 16 }
  0x8c   : > { %3060 = vmatprep.subr.bf16.mxu0 %v3314_v1 }
  0x8d   : > { %3095 = vmatpush3.bf16.msra.mxu1 %v3273_v12  ;;  %v2039_v12 = vshrl.u32 %v3303_v2, 16  ;;  %v2017_v19 = vrot.slane %v2015_v8, 2 }
  0x8e   : > { %3005 = vmatmul.mubr.bf16.gmra.mrb[52].mxu0 %v3269_v13  ;;  %3096 = vmatprep.subr.bf16.mxu1 %v3314_v1  ;;  %v2042_v13 = vshll.u32 %v3303_v2, 16 }
  0x8f   : > { %3041 = vmatmul.mubr.bf16.gmra.mrb[52].mxu1 %v1334_v14  ;;  %3008 = vmatprep.mubr.msk.bf16.mxu0 %vm3315_vm0, %v3314_v1  ;;  %v1566_v14 = vsel %vm1555_vm2, %v1563_v54, %v1565_v3 }
  0x90   : > { %3044 = vmatprep.mubr.msk.bf16.mxu1 %vm3315_vm0, %v3314_v1  ;;  %3061 = vmatpush3.bf16.msra.mxu0 %v3274_v15  ;;  %v1789_v15 = vsel %vm1555_vm2, %v1786_v56, %v1788_v4  ;;  %v2044_v24 = vrot.slane %v2042_v13, 2 }
  0x91   : > { %3097 = vmatpush3.bf16.msra.mxu1 %v3277_v18  ;;  %3062 = vmatprep.subr.bf16.mxu0 %v3314_v1  ;;  %v2014_v18 = vrot.slane %v2012_v7, 1 }
  0x92   : > { %3098 = vmatprep.subr.bf16.mxu1 %v3314_v1 }
  0x93   : > { %v2018_v27 = vor.u32 %v2017_v19, %v2014_v18 }
  0x94   : > { %3063 = vmatpush3.bf16.msra.mxu0 %v3278_v21  ;;  %v2032_v21 = vrot.slane %v2030_v10, 1 }
  0x95   : > { %3099 = vmatpush3.bf16.msra.mxu1 %v3279_v22  ;;  %3120 = vmatprep.subr.bf16.mxu0 %v3314_v1  ;;  %v2035_v22 = vrot.slane %v2033_v11, 2 }
  0x96   : > { %3009 = vmatmul.mubr.bf16.gmra.mrb[56].mxu0 %v3275_v23  ;;  %3156 = vmatprep.subr.bf16.mxu1 %v3314_v1  ;;  %v2041_v23 = vrot.slane %v2039_v12, 1 }
  0x97   : > { %3045 = vmatmul.mubr.bf16.gmra.mrb[56].mxu1 %v1342_v26  ;;  %3064 = vmatprep.mubr.msk.bf16.mxu0 %vm3315_vm0, %v3314_v1  ;;  %v2010_v26 = vor.u32 %v2009_v17, %v2006_v16  ;;  %v2036_v30 = vor.u32 %v2035_v22, %v2032_v21 }
  0x98   : > { %3100 = vmatprep.mubr.msk.bf16.mxu1 %vm3315_vm0, %v3314_v1  ;;  %v2045_v31 = vor.u32 %v2044_v24, %v2041_v23 }
  0x9a   : > { %v2046_v37 = vsel %vm2002_vm3, %v2036_v30, %v2045_v31 }
  0x9e   : > { %3065 = vmatmul.mubr.bf16.vlgmr.msra.gmra.mrb[60].mxu0 %v1558_v33  ;;  %v2051_v33 = vshll.u32 %v3305_v25, 16 }
  0x9f   : > { %3101 = vmatmul.mubr.bf16.vlgmr.msra.gmra.mrb[60].mxu1 %v1781_v36  ;;  %3121 = vmatpush3.bf16.msra.mxu0 %v3284_v34  ;;  %v2026_v36 = vrot.slane %v2024_v29, 2 }
  0xa0   : > { %3122 = vmatprep.subr.bf16.mxu0 %v3314_v1  ;;  %3068 = vmatprep.mubr.msk.bf16.mxu0 %vm3315_vm0, %v3314_v1  ;;  %v2053_v39 = vrot.slane %v2051_v33, 2 }
  0xa1   : > { %3104 = vmatprep.mubr.msk.bf16.mxu1 %vm3315_vm0, %v3314_v1  ;;  %3164 = vmatpush3.bf16.msra.mxu1 %v3284_v34  ;;  %v2019_v34 = vsel %vm2002_vm3, %v2010_v26, %v2018_v27  ;;  %v2027_v40 = vor.u32 %v2026_v36, %v2023_v35 }
  0xa2   : > { %3157 = vmatprep.subr.bf16.mxu1 %v3314_v1 }
  0xa3   : > { %3123 = vmatpush3.bf16.msra.mxu0 %v3285_v38 }
  0xa4   : > { %3124 = vmatprep.subr.bf16.mxu0 %v3314_v1 }
  0xa5   : > { %3165 = vmatpush3.bf16.msra.mxu1 %v3285_v38  ;;  %v2050_v38 = vrot.slane %v2048_v32, 1 }
  0xa6   : > { %3069 = vmatmul.mubr.bf16.gmra.mrb[64].mxu0 %v1560_v41  ;;  %3158 = vmatprep.subr.bf16.mxu1 %v3314_v1 }
  0xa7   : > { %3105 = vmatmul.mubr.bf16.gmra.mrb[64].mxu1 %v1783_v44  ;;  %3125 = vmatpush3.bf16.msra.mxu0 %v3288_v42  ;;  %v2054_v41 = vor.u32 %v2053_v39, %v2050_v38  ;;  %v2037_v44 = vsel %vm2002_vm3, %v2027_v40, %v2036_v30 }
  0xa8   : > { %3072 = vmatprep.mubr.msk.bf16.mxu0 %vm3315_vm0, %v3314_v1  ;;  %3108 = vmatprep.mubr.msk.bf16.mxu1 %vm3315_vm0, %v3314_v1 }
  0xa9   : > { %3126 = vmatprep.subr.bf16.mxu0 %v3314_v1  ;;  %3166 = vmatpush3.bf16.msra.mxu1 %v3288_v42  ;;  %v2028_v42 = vsel %vm2002_vm3, %v2018_v27, %v2027_v40  ;;  %v2055_v43 = vsel %vm2002_vm3, %v2045_v31, %v2054_v41 }
  0xaa   : > { %3159 = vmatprep.subr.bf16.mxu1 %v3314_v1 }
  0xab   : > { %3127 = vmatpush3.bf16.msra.mxu0 %v3291_v47 }
  0xac   : > { %3128 = vmatprep.subr.bf16.mxu0 %v3314_v1 }
  0xad   : > { %3167 = vmatpush3.bf16.msra.mxu1 %v3291_v47 }
  0xae   : > { %3073 = vmatmul.mubr.bf16.gmra.mrb[68].mxu0 %v1562_v49  ;;  %3160 = vmatprep.subr.bf16.mxu1 %v3314_v1 }
  0xaf   : > { %3109 = vmatmul.mubr.bf16.gmra.mrb[68].mxu1 %v1785_v52  ;;  %3129 = vmatpush3.bf16.msra.mxu0 %v3292_v50 }
  0xb0   : > { %3076 = vmatprep.mubr.msk.bf16.mxu0 %vm3315_vm0, %v3314_v1  ;;  %3112 = vmatprep.mubr.msk.bf16.mxu1 %vm3315_vm0, %v3314_v1 }
  0xb1   : > { %3168 = vmatpush3.bf16.msra.mxu1 %v3292_v50  ;;  %3130 = vmatprep.subr.bf16.mxu0 %v3314_v1 }
  0xb2   : > { %3161 = vmatprep.subr.bf16.mxu1 %v3314_v1 }
  0xb3   : > { %3131 = vmatpush3.bf16.msra.mxu0 %v3295_v55 }
  0xb4   : > { %3132 = vmatprep.subr.bf16.mxu0 %v3314_v1 }
  0xb5   : > { %3169 = vmatpush3.bf16.msra.mxu1 %v3295_v55 }
  0xb6   : > { %3077 = vmatmul.mubr.bf16.gmra.mrb[72].mxu0 %v1564_v59  ;;  %3162 = vmatprep.subr.bf16.mxu1 %v3314_v1 }
  0xb7   : > { %3113 = vmatmul.mubr.bf16.gmra.mrb[72].mxu1 %v1787_v62  ;;  %3080 = vmatprep.mubr.msk.bf16.mxu0 %vm3315_vm0, %v3314_v1 }
  0xb8   : > { %3116 = vmatprep.mubr.msk.bf16.mxu1 %vm3315_vm0, %v3314_v1  ;;  %3133 = vmatpush3.bf16.msra.mxu0 %v3296_v63 }
  0xb9   : > { %3170 = vmatpush3.bf16.msra.mxu1 %v3296_v63  ;;  %3134 = vmatprep.subr.bf16.mxu0 %v3314_v1 }
  0xba   : > { %3163 = vmatprep.subr.bf16.mxu1 %v3314_v1 }
  0xbc   : > { %3135 = vmatpush3.bf16.msra.mxu0 %v3299_v9 }
  0xbd   : > { %3171 = vmatpush3.bf16.msra.mxu1 %v3299_v9 }
  0xbe   : > { %3081 = vmatmul.mubr.bf16.gmra.mrb[76].mxu0 %v1566_v14 }
  0xbf   : > { %3117 = vmatmul.mubr.bf16.gmra.mrb[76].mxu1 %v1789_v15  ;;  %3136 = vmatprep.mubr.msk.bf16.mxu0 %vm3315_vm0, %v3314_v1 }
  0xc0   : > { %3148 = vmatprep.mubr.msk.bf16.mxu1 %vm3315_vm0, %v3314_v1 }
  0xc6   : > { %3137 = vmatmul.mubr.bf16.vlgmr.msra.gmra.mrb[80].mxu0 %v2019_v34 }
  0xc7   : > { %3149 = vmatmul.mubr.bf16.vlgmr.msra.gmra.mrb[80].mxu1 %v2046_v37  ;;  %3140 = vmatprep.mubr.msk.bf16.mxu0 %vm3315_vm0, %v3314_v1 }
  0xc8   : > { %3152 = vmatprep.mubr.msk.bf16.mxu1 %vm3315_vm0, %v3314_v1 }
  0xce   : > { %3141 = vmatmul.mubr.bf16.gmra.mrb[84].mxu0 %v2028_v42 }
  0xcf   : > { %3153 = vmatmul.mubr.bf16.gmra.mrb[84].mxu1 %v2055_v43  ;;  %3144 = vmatprep.mubr.msk.bf16.mxu0 %vm3315_vm0, %v3314_v1 }
  0xd6   : > { %3145 = vmatmul.mubr.bf16.gmra.mrb[88].mxu0 %v2037_v44 }
  0xf9   : > { %v310_v45 = vpop.f32.mrb[0].mxu0 }
  0xfa   : > { %v499_v46 = vpop.f32.mrb[0].mxu1  ;;  %v2850_v47 = vpop.f32.mrb[1].mxu0 }
  0xfb   : > { %v548_v48 = vadd.f32 %v499_v46, %v310_v45  ;;  %v2886_v49 = vpop.f32.mrb[1].mxu1  ;;  %v313_v50 = vpop.f32.mrb[2].mxu0 }
  0xfc   : > { %v502_v51 = vpop.f32.mrb[2].mxu1  ;;  %v2851_v52 = vpop.f32.mrb[3].mxu0 }
  0xfd   : > { %v549_v53 = vadd.f32 %v502_v51, %v313_v50  ;;  %v2887_v54 = vpop.f32.mrb[3].mxu1 }
 0x101   : > { %v318_v55 = vpop.f32.mrb[4].mxu0 }
 0x102   : > { %v507_v56 = vpop.f32.mrb[4].mxu1  ;;  %v2854_v57 = vpop.f32.mrb[5].mxu0 }
 0x103   : > { %v550_v58 = vadd.f32 %v507_v56, %v318_v55  ;;  %v2890_v59 = vpop.f32.mrb[5].mxu1  ;;  %v321_v60 = vpop.f32.mrb[6].mxu0 }
 0x104   : > { %v510_v1 = vpop.f32.mrb[6].mxu1  ;;  %v2855_v61 = vpop.f32.mrb[7].mxu0 }
 0x105   : > { %v551_v62 = vadd.f32 %v510_v1, %v321_v60  ;;  %v2891_v63 = vpop.f32.mrb[7].mxu1 }
 0x109   : > { %v326_v0 = vpop.f32.mrb[8].mxu0 }
 0x10a   : > { %v515_v2 = vpop.f32.mrb[8].mxu1  ;;  %v2858_v3 = vpop.f32.mrb[9].mxu0 }
 0x10b   : > { %v552_v4 = vadd.f32 %v515_v2, %v326_v0  ;;  %v2894_v5 = vpop.f32.mrb[9].mxu1  ;;  %v329_v6 = vpop.f32.mrb[10].mxu0 }
 0x10c   : > { %v518_v7 = vpop.f32.mrb[10].mxu1  ;;  %v2859_v8 = vpop.f32.mrb[11].mxu0 }
 0x10d   : > { %v553_v9 = vadd.f32 %v518_v7, %v329_v6  ;;  %v2895_v10 = vpop.f32.mrb[11].mxu1 }
 0x111   : > { %v334_v11 = vpop.f32.mrb[12].mxu0 }
 0x112   : > { %v523_v12 = vpop.f32.mrb[12].mxu1  ;;  %v2862_v13 = vpop.f32.mrb[13].mxu0 }
 0x113   : > { %v554_v14 = vadd.f32 %v523_v12, %v334_v11  ;;  %v2898_v15 = vpop.f32.mrb[13].mxu1  ;;  %v337_v16 = vpop.f32.mrb[14].mxu0 }
 0x114   : > { %v526_v17 = vpop.f32.mrb[14].mxu1  ;;  %v2863_v18 = vpop.f32.mrb[15].mxu0 }
 0x115   : > { %v555_v19 = vadd.f32 %v526_v17, %v337_v16  ;;  %v2899_v20 = vpop.f32.mrb[15].mxu1 }
 0x119   : > { %v342_v21 = vpop.f32.mrb[16].mxu0 }
 0x11a   : > { %v531_v22 = vpop.f32.mrb[16].mxu1  ;;  %v2866_v23 = vpop.f32.mrb[17].mxu0 }
 0x11b   : > { %v556_v24 = vadd.f32 %v531_v22, %v342_v21  ;;  %v2902_v25 = vpop.f32.mrb[17].mxu1  ;;  %v345_v26 = vpop.f32.mrb[18].mxu0 }
 0x11c   : > { %v534_v27 = vpop.f32.mrb[18].mxu1  ;;  %v2867_v28 = vpop.f32.mrb[19].mxu0 }
 0x11d   : > { %v557_v29 = vadd.f32 %v534_v27, %v345_v26  ;;  %v2903_v30 = vpop.f32.mrb[19].mxu1 }
 0x121   : > { %v756_v31 = vpop.f32.mrb[20].mxu0 }
 0x122   : > { %v805_v32 = vadd.f32 %v756_v31, %v548_v48  ;;  %v2922_v33 = vpop.f32.mrb[21].mxu0  ;;  %v965_v34 = vpop.f32.mrb[20].mxu1 }
 0x123   : > { %v759_v35 = vpop.f32.mrb[22].mxu0  ;;  %v2958_v36 = vpop.f32.mrb[21].mxu1 }
 0x124   : > { %v806_v37 = vadd.f32 %v759_v35, %v549_v53  ;;  %v1014_v38 = vadd.f32 %v965_v34, %v805_v32  ;;  %v2923_v39 = vpop.f32.mrb[23].mxu0  ;;  %v968_v40 = vpop.f32.mrb[22].mxu1 }
 0x125   : > { %v2959_v41 = vpop.f32.mrb[23].mxu1 }
 0x126   : > { %v1015_v42 = vadd.f32 %v968_v40, %v806_v37 }
 0x129   : > { %v764_v43 = vpop.f32.mrb[24].mxu0 }
 0x12a   : > { %v807_v44 = vadd.f32 %v764_v43, %v550_v58  ;;  %v2926_v45 = vpop.f32.mrb[25].mxu0  ;;  %v973_v46 = vpop.f32.mrb[24].mxu1 }
 0x12b   : > { %v767_v47 = vpop.f32.mrb[26].mxu0  ;;  %v2962_v49 = vpop.f32.mrb[25].mxu1 }
 0x12c   : > { %v808_v50 = vadd.f32 %v767_v47, %v551_v62  ;;  %v1016_v51 = vadd.f32 %v973_v46, %v807_v44  ;;  %v2927_v52 = vpop.f32.mrb[27].mxu0  ;;  %v976_v48 = vpop.f32.mrb[26].mxu1 }
 0x12d   : > { %v2963_v54 = vpop.f32.mrb[27].mxu1 }
 0x12e   : > { %v1017_v55 = vadd.f32 %v976_v48, %v808_v50 }
 0x131   : > { %v772_v56 = vpop.f32.mrb[28].mxu0 }
 0x132   : > { %v809_v57 = vadd.f32 %v772_v56, %v552_v4  ;;  %v2930_v53 = vpop.f32.mrb[29].mxu0  ;;  %v981_v59 = vpop.f32.mrb[28].mxu1 }
 0x133   : > { %v775_v60 = vpop.f32.mrb[30].mxu0  ;;  %v2966_v1 = vpop.f32.mrb[29].mxu1 }
 0x134   : > { %v810_v61 = vadd.f32 %v775_v60, %v553_v9  ;;  %v1018_v63 = vadd.f32 %v981_v59, %v809_v57  ;;  %v2931_v0 = vpop.f32.mrb[31].mxu0  ;;  %v984_v58 = vpop.f32.mrb[30].mxu1 }
 0x135   : > { %v2967_v2 = vpop.f32.mrb[31].mxu1 }
 0x136   : > { %v1019_v3 = vadd.f32 %v984_v58, %v810_v61 }
 0x139   : > { %v780_v5 = vpop.f32.mrb[32].mxu0 }
 0x13a   : > { %v811_v6 = vadd.f32 %v780_v5, %v554_v14  ;;  %v2934_v62 = vpop.f32.mrb[33].mxu0  ;;  %v989_v7 = vpop.f32.mrb[32].mxu1 }
 0x13b   : > { %v783_v8 = vpop.f32.mrb[34].mxu0  ;;  %v2970_v10 = vpop.f32.mrb[33].mxu1 }
 0x13c   : > { %v812_v11 = vadd.f32 %v783_v8, %v555_v19  ;;  %v1020_v12 = vadd.f32 %v989_v7, %v811_v6  ;;  %v2935_v13 = vpop.f32.mrb[35].mxu0  ;;  %v992_v4 = vpop.f32.mrb[34].mxu1 }
 0x13d   : > { %v2971_v15 = vpop.f32.mrb[35].mxu1 }
 0x13e   : > { %v1021_v16 = vadd.f32 %v992_v4, %v812_v11 }
 0x141   : > { %v788_v17 = vpop.f32.mrb[36].mxu0 }
 0x142   : > { %v813_v18 = vadd.f32 %v788_v17, %v556_v24  ;;  %v2938_v9 = vpop.f32.mrb[37].mxu0  ;;  %v997_v20 = vpop.f32.mrb[36].mxu1 }
 0x143   : > { %v791_v21 = vpop.f32.mrb[38].mxu0  ;;  %v2974_v22 = vpop.f32.mrb[37].mxu1 }
 0x144   : > { %v814_v23 = vadd.f32 %v791_v21, %v557_v29  ;;  %v1022_v25 = vadd.f32 %v997_v20, %v813_v18  ;;  %v2939_v26 = vpop.f32.mrb[39].mxu0  ;;  %v1000_v14 = vpop.f32.mrb[38].mxu1 }
 0x145   : > { %v2975_v27 = vpop.f32.mrb[39].mxu1 }
 0x146   : > { %v1023_v28 = vadd.f32 %v1000_v14, %v814_v23 }
 0x149   : > { %v1174_v30 = vpop.f32.mrb[40].mxu0 }
 0x14a   : > { %v1223_v31 = vadd.f32 %v1174_v30, %v1014_v38  ;;  %v2994_v19 = vpop.f32.mrb[41].mxu0  ;;  %v1430_v32 = vpop.f32.mrb[40].mxu1 }
 0x14b   : > { %v1177_v33 = vpop.f32.mrb[42].mxu0  ;;  %v3030_v34 = vpop.f32.mrb[41].mxu1 }
 0x14c   : > { %v1224_v35 = vadd.f32 %v1177_v33, %v1015_v42  ;;  %v1479_v36 = vadd.f32 %v1430_v32, %v1223_v31  ;;  %v2995_v37 = vpop.f32.mrb[43].mxu0  ;;  %v1433_v24 = vpop.f32.mrb[42].mxu1 }
 0x14d   : > { %v3031_v39 = vpop.f32.mrb[43].mxu1 }
 0x14e   : > { %v1480_v40 = vadd.f32 %v1433_v24, %v1224_v35 }
 0x151   : > { %v1182_v41 = vpop.f32.mrb[44].mxu0 }
 0x152   : > { %v1225_v43 = vadd.f32 %v1182_v41, %v1016_v51  ;;  %v2998_v29 = vpop.f32.mrb[45].mxu0  ;;  %v1438_v44 = vpop.f32.mrb[44].mxu1 }
 0x153   : > { %v1185_v45 = vpop.f32.mrb[46].mxu0  ;;  %v3034_v46 = vpop.f32.mrb[45].mxu1 }
 0x154   : > { %v1226_v47 = vadd.f32 %v1185_v45, %v1017_v55  ;;  %v1481_v49 = vadd.f32 %v1438_v44, %v1225_v43  ;;  %v2999_v50 = vpop.f32.mrb[47].mxu0  ;;  %v1441_v38 = vpop.f32.mrb[46].mxu1 }
 0x155   : > { %v3035_v52 = vpop.f32.mrb[47].mxu1 }
 0x156   : > { %v1482_v48 = vadd.f32 %v1441_v38, %v1226_v47 }
 0x159   : > { %v1190_v54 = vpop.f32.mrb[48].mxu0 }
 0x15a   : > { %v1227_v56 = vadd.f32 %v1190_v54, %v1018_v63  ;;  %v3002_v42 = vpop.f32.mrb[49].mxu0  ;;  %v1446_v57 = vpop.f32.mrb[48].mxu1 }
 0x15b   : > { %v1193_v53 = vpop.f32.mrb[50].mxu0  ;;  %v3038_v59 = vpop.f32.mrb[49].mxu1 }
 0x15c   : > { %v1228_v60 = vadd.f32 %v1193_v53, %v1019_v3  ;;  %v1483_v1 = vadd.f32 %v1446_v57, %v1227_v56  ;;  %v3003_v61 = vpop.f32.mrb[51].mxu0  ;;  %v1449_v51 = vpop.f32.mrb[50].mxu1 }
 0x15d   : > { %v3039_v0 = vpop.f32.mrb[51].mxu1 }
 0x15e   : > { %v1484_v58 = vadd.f32 %v1449_v51, %v1228_v60 }
 0x161   : > { %v1198_v2 = vpop.f32.mrb[52].mxu0 }
 0x162   : > { %v1229_v5 = vadd.f32 %v1198_v2, %v1020_v12  ;;  %v3006_v55 = vpop.f32.mrb[53].mxu0  ;;  %v1454_v6 = vpop.f32.mrb[52].mxu1 }
 0x163   : > { %v1201_v62 = vpop.f32.mrb[54].mxu0  ;;  %v3042_v7 = vpop.f32.mrb[53].mxu1 }
 0x164   : > { %v1230_v8 = vadd.f32 %v1201_v62, %v1021_v16  ;;  %v1485_v10 = vadd.f32 %v1454_v6, %v1229_v5  ;;  %v3007_v11 = vpop.f32.mrb[55].mxu0  ;;  %v1457_v63 = vpop.f32.mrb[54].mxu1 }
 0x165   : > { %v3043_v13 = vpop.f32.mrb[55].mxu1 }
 0x166   : > { %v1486_v4 = vadd.f32 %v1457_v63, %v1230_v8 }
 0x169   : > { %v1206_v15 = vpop.f32.mrb[56].mxu0 }
 0x16a   : > { %v1231_v17 = vadd.f32 %v1206_v15, %v1022_v25  ;;  %v3010_v3 = vpop.f32.mrb[57].mxu0  ;;  %v1462_v18 = vpop.f32.mrb[56].mxu1 }
 0x16b   : > { %v1209_v9 = vpop.f32.mrb[58].mxu0  ;;  %v3046_v20 = vpop.f32.mrb[57].mxu1 }
 0x16c   : > { %v1232_v21 = vadd.f32 %v1209_v9, %v1023_v28  ;;  %v1487_v22 = vadd.f32 %v1462_v18, %v1231_v17  ;;  %v3011_v23 = vpop.f32.mrb[59].mxu0  ;;  %v1465_v12 = vpop.f32.mrb[58].mxu1 }
 0x16d   : > { %v3047_v26 = vpop.f32.mrb[59].mxu1 }
 0x16e   : > { %v1488_v14 = vadd.f32 %v1465_v12, %v1232_v21 }
 0x171   : > { %v1654_v27 = vpop.f32.mrb[60].mxu0 }
 0x172   : > { %v1703_v30 = vadd.f32 %v1654_v27, %v1479_v36  ;;  %v3066_v16 = vpop.f32.mrb[61].mxu0  ;;  %v1877_v31 = vpop.f32.mrb[60].mxu1 }
 0x173   : > { %v1657_v19 = vpop.f32.mrb[62].mxu0  ;;  %v3102_v32 = vpop.f32.mrb[61].mxu1 }
 0x174   : > { %v1704_v33 = vadd.f32 %v1657_v19, %v1480_v40  ;;  %v1926_v34 = vadd.f32 %v1877_v31, %v1703_v30  ;;  %v3067_v35 = vpop.f32.mrb[63].mxu0  ;;  %v1880_v25 = vpop.f32.mrb[62].mxu1 }
 0x175   : > { %v3103_v37 = vpop.f32.mrb[63].mxu1 }
 0x176   : > { %v1927_v24 = vadd.f32 %v1880_v25, %v1704_v33 }
 0x179   : > { %v1662_v39 = vpop.f32.mrb[64].mxu0 }
 0x17a   : > { %v1705_v41 = vadd.f32 %v1662_v39, %v1481_v49  ;;  %v3070_v28 = vpop.f32.mrb[65].mxu0  ;;  %v1885_v43 = vpop.f32.mrb[64].mxu1 }
 0x17b   : > { %v1665_v29 = vpop.f32.mrb[66].mxu0  ;;  %v3106_v44 = vpop.f32.mrb[65].mxu1 }
 0x17c   : > { %v1706_v45 = vadd.f32 %v1665_v29, %v1482_v48  ;;  %v3813_v46 = vadd.f32 %v1885_v43, %v1705_v41  ;;  %v3071_v36 = vpop.f32.mrb[67].mxu0  ;;  %v1888_v47 = vpop.f32.mrb[66].mxu1 }
 0x17d   : > { %v3107_v50 = vpop.f32.mrb[67].mxu1 }
 0x17e   : > { %v3815_v38 = vadd.f32 %v1888_v47, %v1706_v45 }
 0x181   : > { %v1670_v40 = vpop.f32.mrb[68].mxu0 }
 0x182   : > { %v1707_v52 = vadd.f32 %v1670_v40, %v1483_v1  ;;  %v3074_v54 = vpop.f32.mrb[69].mxu0  ;;  %v1893_v56 = vpop.f32.mrb[68].mxu1 }
 0x183   : > { %v1673_v42 = vpop.f32.mrb[70].mxu0  ;;  %v3110_v57 = vpop.f32.mrb[69].mxu1 }
 0x184   : > { %v1708_v53 = vadd.f32 %v1673_v42, %v1484_v58  ;;  %v3817_v49 = vadd.f32 %v1893_v56, %v1707_v52  ;;  %v3075_v59 = vpop.f32.mrb[71].mxu0  ;;  %v1896_v60 = vpop.f32.mrb[70].mxu1 }
 0x185   : > { %v3111_v61 = vpop.f32.mrb[71].mxu1 }
 0x186   : > { %v3819_v48 = vadd.f32 %v1896_v60, %v1708_v53 }
 0x189   : > { %v1678_v51 = vpop.f32.mrb[72].mxu0 }
 0x18a   : > { %v1709_v0 = vadd.f32 %v1678_v51, %v1485_v10  ;;  %v3078_v2 = vpop.f32.mrb[73].mxu0  ;;  %v1901_v5 = vpop.f32.mrb[72].mxu1 }
 0x18b   : > { %v1681_v55 = vpop.f32.mrb[74].mxu0  ;;  %v3114_v6 = vpop.f32.mrb[73].mxu1 }
 0x18c   : > { %v1710_v62 = vadd.f32 %v1681_v55, %v1486_v4  ;;  %v1932_v1 = vadd.f32 %v1901_v5, %v1709_v0  ;;  %v3079_v7 = vpop.f32.mrb[75].mxu0  ;;  %v1904_v8 = vpop.f32.mrb[74].mxu1  ;;  %v2663_v4 = vld [vmem:[%s3844_s2] ss:$0 sm:$0xff] }
 0x18d   : > { %v3115_v11 = vpop.f32.mrb[75].mxu1 }
 0x18e   : > { %v1933_v63 = vadd.f32 %v1904_v8, %v1710_v62 }
 0x191   : > { %v1686_v58 = vpop.f32.mrb[76].mxu0 }
 0x192   : > { %v1711_v13 = vadd.f32 %v1686_v58, %v1487_v22  ;;  %v3082_v15 = vpop.f32.mrb[77].mxu0  ;;  %v1909_v17 = vpop.f32.mrb[76].mxu1 }
 0x193   : > { %v1689_v3 = vpop.f32.mrb[78].mxu0  ;;  %v3118_v18 = vpop.f32.mrb[77].mxu1 }
 0x194   : > { %v1712_v9 = vadd.f32 %v1689_v3, %v1488_v14  ;;  %v1934_v20 = vadd.f32 %v1909_v17, %v1711_v13  ;;  %v3083_v21 = vpop.f32.mrb[79].mxu0  ;;  %v1912_v10 = vpop.f32.mrb[78].mxu1 }
 0x195   : > { %v3119_v23 = vpop.f32.mrb[79].mxu1 }
 0x196   : > { %v1935_v12 = vadd.f32 %v1912_v10, %v1712_v9 }
 0x199   : > { %v2143_v26 = vpop.f32.mrb[80].mxu0 }
 0x19a   : > { %v2192_v27 = vadd.f32 %v2143_v26, %v1926_v34  ;;  %v2167_v30 = vpop.f32.mrb[80].mxu1  ;;  %v3138_v16 = vpop.f32.mrb[81].mxu0 }
 0x19b   : > { %v2198_v22 = vadd.f32 %v2167_v30, %v1932_v1  ;;  %v3150_v31 = vpop.f32.mrb[81].mxu1  ;;  %v2146_v19 = vpop.f32.mrb[82].mxu0 }
 0x19c   : > { %v2229_v32 = vadd.f32 %v2663_v4, %v2192_v27  ;;  %v2193_v33 = vadd.f32 %v2146_v19, %v1927_v24  ;;  %v2170_v14 = vpop.f32.mrb[82].mxu1  ;;  %v3139_v35 = vpop.f32.mrb[83].mxu0 }
 0x19d   : > { %v2235_v25 = vadd.f32 %v2663_v4, %v2198_v22  ;;  %v2199_v37 = vadd.f32 %v2170_v14, %v1933_v63  ;;  %v3151_v39 = vpop.f32.mrb[83].mxu1 }
 0x19e   : > { %v2230_v41 = vadd.f32 %v2663_v4, %v2193_v33  ;;  %v2239_v43 = vmax.f32 %v2229_v32, 0.0 }
 0x19f   : > { %v2236_v28 = vadd.f32 %v2663_v4, %v2199_v37  ;;  %v2245_v44 = vmax.f32 %v2235_v25, 0.0 }
 0x1a0   : > { %v2240_v29 = vmax.f32 %v2230_v41, 0.0 }
 0x1a1   : > { %v2246_v34 = vmax.f32 %v2236_v28, 0.0  ;;  %v2151_v24 = vpop.f32.mrb[84].mxu0 }
 0x1a2   : > { %v2689_v45 = vpack.c.bf16 %v2240_v29, %v2239_v43  ;;  %v2194_v36 = vadd.f32 %v2151_v24, %v3813_v46  ;;  %v2175_v47 = vpop.f32.mrb[84].mxu1  ;;  %v3142_v50 = vpop.f32.mrb[85].mxu0 }
 0x1a3   : > { %v2704_v40 = vpack.c.bf16 %v2246_v34, %v2245_v44  ;;  %v2200_v52 = vadd.f32 %v2175_v47, %v1934_v20  ;;  %v3154_v54 = vpop.f32.mrb[85].mxu1  ;;  %v2154_v56 = vpop.f32.mrb[86].mxu0 }
 0x1a4   : > { %2690 = vst [vmem:[%s3828_s21] sm:$0xff] %v2689_v45   ;;  %v2231_v42 = vadd.f32 %v2663_v4, %v2194_v36  ;;  %v2195_v57 = vadd.f32 %v2154_v56, %v3815_v38  ;;  %v2178_v53 = vpop.f32.mrb[86].mxu1  ;;  %v3143_v59 = vpop.f32.mrb[87].mxu0 }
 0x1a5   : > { %2713 = vst [vmem:[%s3828_s21 + $0x18] sm:$0xff] %v2704_v40   ;;  %v2237_v60 = vadd.f32 %v2663_v4, %v2200_v52  ;;  %v2201_v61 = vadd.f32 %v2178_v53, %v1935_v12  ;;  %v3155_v51 = vpop.f32.mrb[87].mxu1 }
 0x1a6   : > { %v2232_v0 = vadd.f32 %v2663_v4, %v2195_v57  ;;  %v2241_v2 = vmax.f32 %v2231_v42, 0.0 }
 0x1a7   : > { %v2238_v46 = vadd.f32 %v2663_v4, %v2201_v61  ;;  %v2247_v55 = vmax.f32 %v2237_v60, 0.0 }
 0x1a8   : > { %v2242_v5 = vmax.f32 %v2232_v0, 0.0 }
 0x1a9   : > { %v2248_v6 = vmax.f32 %v2238_v46, 0.0  ;;  %v2159_v62 = vpop.f32.mrb[88].mxu0 }
 0x1aa   : > { %v2694_v1 = vpack.c.bf16 %v2242_v5, %v2241_v2  ;;  %v2196_v7 = vadd.f32 %v2159_v62, %v3817_v49  ;;  %v3146_v38 = vpop.f32.mrb[89].mxu0 }
 0x1ab   : > { %v2709_v8 = vpack.c.bf16 %v2248_v6, %v2247_v55  ;;  %v2162_v11 = vpop.f32.mrb[90].mxu0 }
 0x1ac   : > { %2711 = vst [vmem:[%s3828_s21 + $0x8] sm:$0xff] %v2694_v1   ;;  %v2233_v63 = vadd.f32 %v2663_v4, %v2196_v7  ;;  %v2197_v58 = vadd.f32 %v2162_v11, %v3819_v48  ;;  %v3147_v13 = vpop.f32.mrb[91].mxu0 }
 0x1ad   : > { %2714 = vst [vmem:[%s3828_s21 + $0x20] sm:$0xff] %v2709_v8  }
 0x1ae   : > { %v2234_v15 = vadd.f32 %v2663_v4, %v2197_v58  ;;  %v2243_v17 = vmax.f32 %v2233_v63, 0.0 }
 0x1b0   : > { %v2244_v3 = vmax.f32 %v2234_v15, 0.0 }
 0x1b2   : > { %v2699_v18 = vpack.c.bf16 %v2244_v3, %v2243_v17 }
 0x1b4   : > { %2712 = vst [vmem:[%s3828_s21 + $0x10] sm:$0xff] %v2699_v18  }
 0x1b5 PF: > { %s13_s12 = sadd.s32 1, %s3312_s12  }
 0x1b6   : > { %p10_p4 = scmp.ge.s32.totalorder %s13_s12, 4  }
 0x1b8   :  { %12 = sbr.rel (!%p10_p4) target bundleno = 1 (0x1), region = 73 }

// kernel: bottle_top_pallas.5
= control target key start
LH: loop header
LB: loop body
LE: loop exit
PB: predicated region body
PF: predicated region fallthrough
CT: control target
= control target key end

     0   :  { %s1268_s21 = smov 0   ;;  %s1270_s22 = smov 0   ;;  %s1375_s0 = inlined_call_operand.vmem [shape: bf16[128,128], index: 0, kind: input, shape index: {}]   ;;  %s1376_s1 = inlined_call_operand.vmem [shape: bf16[128,128], index: 1, kind: input, shape index: {}]   ;;  %s1377_s2 = inlined_call_operand.vmem [shape: f32[1,128], index: 2, kind: input, shape index: {}]   ;;  %s1378_s3 = inlined_call_operand.vmem [shape: bf16[128,128], index: 3, kind: input, shape index: {}]   ;;  %s1379_s4 = inlined_call_operand.vmem [shape: bf16[128,128], index: 4, kind: input, shape index: {}]   ;;  %s1380_s5 = inlined_call_operand.vmem [shape: f32[1,128], index: 5, kind: input, shape index: {}]   ;;  %s1381_s6 = inlined_call_operand.vmem [shape: bf16[128,128], index: 6, kind: output, shape index: {}]  }
   0x1   :  { %s1272_s23 = smov 0  }
   0x2 LB: > { %s35_s24 = sadd.s32 1, %s1227_s22  ;;  %p991_p0 = scmp.ge.s32.totalorder %s1231_s23, 1  ;;  %s1231_s23 = sphi %s1272_s23, %s16_s23   ;;  %s1227_s22 = sphi %s1270_s22, %s1383_s22   ;;  %s1223_s21 = sphi %s1268_s21, %s1382_s21  }
   0x3   : > { %p37_p1 = scmp.ge.s32.totalorder %s35_s24, 2  ;;  %p291_p2 = scmp.lt.s32.totalorder %s1231_s23, 3 }
   0x5   : > { %s1385_s24 = smov (%p37_p1, %s35_s24), 0  ;;  %p292_p3 = pnand %p991_p0, %p291_p2 }
   0x6   : > { %v1185_v0 = vld [vmem:[%s1379_s4] sm:$0xff] (!%p292_p3)   ;;  %s992_s27 = sshll.u32 (!%p292_p3), %s1223_s21, 3  ;;  %v1187_v2 = vld [vmem:[%s1379_s4 + $0x8] sm:$0xff] (!%p292_p3)   ;;  %v1189_v4 = vld [vmem:[%s1379_s4 + $0x10] sm:$0xff] (!%p292_p3)  }
   0x7   : > { %295 = sbr.rel (%p292_p3) target bundleno = 273 (0x111), region = 44  ;;  %v1186_v1 = vld [vmem:[%s1376_s1] sm:$0xff] (!%p292_p3)   ;;  %1089 = vmatprep.subr.bf16.mxu1 (!%p292_p3), %v1185_v0  ;;  %p351_p4 = scmp.lt.s32.totalorder (!%p292_p3), %s992_s27, 15  ;;  %v1188_v3 = vld [vmem:[%s1376_s1 + $0x8] sm:$0xff] (!%p292_p3)   ;;  %v1190_v5 = vld [vmem:[%s1376_s1 + $0x10] sm:$0xff] (!%p292_p3)  }
   0x8   : > { %1090 = vmatpush3.bf16.msra.mxu1 (!%p292_p3), %v1185_v0  ;;  %1113 = vmatprep.subr.bf16.mxu0 (!%p292_p3), %v1186_v1  ;;  %v1191_v6 = vld [vmem:[%s1379_s4 + $0x18] sm:$0xff] (!%p292_p3)   ;;  %v1193_v8 = vld [vmem:[%s1379_s4 + $0x20] sm:$0xff] (!%p292_p3)   ;;  %v1195_v10 = vld [vmem:[%s1379_s4 + $0x28] sm:$0xff] (!%p292_p3)  }
   0x9   : > { %1114 = vmatpush3.bf16.msra.mxu0 (!%p292_p3), %v1186_v1  ;;  %1091 = vmatprep.subr.bf16.mxu1 (!%p292_p3), %v1187_v2  ;;  %v1192_v7 = vld [vmem:[%s1376_s1 + $0x18] sm:$0xff] (!%p292_p3)   ;;  %v1194_v9 = vld [vmem:[%s1376_s1 + $0x20] sm:$0xff] (!%p292_p3)   ;;  %v1196_v12 = vld [vmem:[%s1376_s1 + $0x28] sm:$0xff] (!%p292_p3)  }
   0xa   : > { %1115 = vmatprep.subr.bf16.mxu0 (!%p292_p3), %v1188_v3  ;;  %v1197_v14 = vld [vmem:[%s1379_s4 + $0x30] sm:$0xff] (!%p292_p3)   ;;  %v1199_v16 = vld [vmem:[%s1379_s4 + $0x38] sm:$0xff] (!%p292_p3)   ;;  %v998_v24 = vld [vmem:[%s1380_s5] ss:$0 sm:$0xff] (!%p292_p3) }
   0xb   : > { %v1198_v15 = vld [vmem:[%s1376_s1 + $0x30] sm:$0xff] (!%p292_p3)   ;;  %v1200_v17 = vld [vmem:[%s1376_s1 + $0x38] sm:$0xff] (!%p292_p3)   ;;  %v1011_v26 = vld [vmem:[%s1377_s2] ss:$0 sm:$0xff] (!%p292_p3) }
   0xc   : > { %1092 = vmatpush3.bf16.msra.mxu1 (!%p292_p3), %v1187_v2 }
   0xd   : > { %1116 = vmatpush3.bf16.msra.mxu0 (!%p292_p3), %v1188_v3  ;;  %1093 = vmatprep.subr.bf16.mxu1 (!%p292_p3), %v1189_v4 }
   0xe   : > { %s1387_s27 = smov (!%p351_p4, %s992_s27), 15  ;;  %1117 = vmatprep.subr.bf16.mxu0 %v1190_v5 }
   0xf   : > { %s1310_s18 = sshll.u32 %s1387_s27, 2 }
  0x10   : > { %1094 = vmatpush3.bf16.msra.mxu1 %v1189_v4  ;;  %s1322_s29 = scalar_lea.vmem %s1378_s3, %s1310_s18  ;;  %s1331_s9 = scalar_lea.vmem %s1375_s0, %s1310_s18 }
  0x11   : > { %1118 = vmatpush3.bf16.msra.mxu0 %v1190_v5  ;;  %1095 = vmatprep.subr.bf16.mxu1 %v1191_v6  ;;  %v1201_v11 = vld [vmem:[%s1322_s29] sm:$0xff]   ;;  %v1202_v18 = vld [vmem:[%s1322_s29 + $0x8] sm:$0xff]   ;;  %v1205_v20 = vld [vmem:[%s1322_s29 + $0x10] sm:$0xff]   ;;  %s391_s30 = scalar_lea.vmem %s1381_s6, %s1310_s18 }
  0x12   : > { %1119 = vmatprep.subr.bf16.mxu0 %v1192_v7  ;;  %1105 = vmatprep.mubr.bf16.mxu1 %v1201_v11  ;;  %v1203_v13 = vld [vmem:[%s1331_s9] sm:$0xff]   ;;  %v1204_v19 = vld [vmem:[%s1331_s9 + $0x8] sm:$0xff]   ;;  %v1207_v21 = vld [vmem:[%s1331_s9 + $0x10] sm:$0xff]  }
  0x13   : > { %1129 = vmatprep.mubr.bf16.mxu0 %v1203_v13  ;;  %v1206_v22 = vld [vmem:[%s1322_s29 + $0x18] sm:$0xff]  }
  0x14   : > { %1096 = vmatpush3.bf16.msra.mxu1 %v1191_v6  ;;  %v1208_v23 = vld [vmem:[%s1331_s9 + $0x18] sm:$0xff]  }
  0x15   : > { %1120 = vmatpush3.bf16.msra.mxu0 %v1192_v7  ;;  %1097 = vmatprep.subr.bf16.mxu1 %v1193_v8 }
  0x16   : > { %1121 = vmatprep.subr.bf16.mxu0 %v1194_v9 }
  0x18   : > { %1098 = vmatpush3.bf16.msra.mxu1 %v1193_v8 }
  0x19   : > { %1122 = vmatpush3.bf16.msra.mxu0 %v1194_v9  ;;  %1099 = vmatprep.subr.bf16.mxu1 %v1195_v10 }
  0x1a   : > { %1123 = vmatprep.subr.bf16.mxu0 %v1196_v12 }
  0x1c   : > { %1100 = vmatpush3.bf16.msra.mxu1 %v1195_v10 }
  0x1d   : > { %1124 = vmatpush3.bf16.msra.mxu0 %v1196_v12  ;;  %1101 = vmatprep.subr.bf16.mxu1 %v1197_v14 }
  0x1e   : > { %1125 = vmatprep.subr.bf16.mxu0 %v1198_v15 }
  0x20   : > { %1102 = vmatpush3.bf16.msra.mxu1 %v1197_v14 }
  0x21   : > { %1126 = vmatpush3.bf16.msra.mxu0 %v1198_v15  ;;  %1103 = vmatprep.subr.bf16.mxu1 %v1199_v16 }
  0x22   : > { %1127 = vmatprep.subr.bf16.mxu0 %v1200_v17 }
  0x24   : > { %1104 = vmatpush3.bf16.msra.mxu1 %v1199_v16 }
  0x25   : > { %1128 = vmatpush3.bf16.msra.mxu0 %v1200_v17 }
  0x27   : > { %1106 = vmatmul.mubr.bf16.vlgmr.msra.gmra.mrb[0].mxu1 %v1202_v18 }
  0x28   : > { %1130 = vmatmul.mubr.bf16.vlgmr.msra.gmra.mrb[0].mxu0 %v1204_v19  ;;  %1109 = vmatprep.mubr.bf16.mxu1 %v1205_v20 }
  0x29   : > { %1133 = vmatprep.mubr.bf16.mxu0 %v1207_v21 }
  0x2f   : > { %1110 = vmatmul.mubr.bf16.gmra.mrb[4].mxu1 %v1206_v22 }
  0x30   : > { %1134 = vmatmul.mubr.bf16.gmra.mrb[4].mxu0 %v1208_v23 }
  0xfa   : > { %v1107_v25 = vpop.f32.mrb[0].mxu1 }
  0xfb   : > { %v544_v27 = vadd.f32 %v1107_v25, %v998_v24  ;;  %v535_v28 = vpop.f32.mrb[1].mxu1  ;;  %v1131_v29 = vpop.f32.mrb[0].mxu0 }
  0xfc   : > { %v536_v30 = vadd.f32 %v998_v24, %v535_v28  ;;  %v1108_v31 = vpop.f32.mrb[2].mxu1  ;;  %v727_v32 = vpop.f32.mrb[1].mxu0 }
  0xfd   : > { %v575_v33 = vadd.f32 %v1011_v26, %v544_v27  ;;  %v547_v34 = vadd.f32 %v1108_v31, %v998_v24  ;;  %v538_v35 = vpop.f32.mrb[3].mxu1  ;;  %v1132_v36 = vpop.f32.mrb[2].mxu0 }
  0xfe   : > { %v573_v37 = vadd.f32 %v1011_v26, %v536_v30  ;;  %v539_v38 = vadd.f32 %v998_v24, %v538_v35  ;;  %v730_v39 = vpop.f32.mrb[3].mxu0 }
  0xff   : > { %v760_v40 = vadd.f32 %v1131_v29, %v575_v33  ;;  %v576_v41 = vadd.f32 %v1011_v26, %v547_v34 }
 0x100   : > { %v758_v42 = vadd.f32 %v727_v32, %v573_v37  ;;  %v574_v43 = vadd.f32 %v1011_v26, %v539_v38 }
 0x101   : > { %v761_v44 = vadd.f32 %v1132_v36, %v576_v41  ;;  %v787_v47 = vmax.f32 %v760_v40, 0.0 }
 0x102   : > { %v759_v45 = vadd.f32 %v730_v39, %v574_v43  ;;  %v1111_v46 = vpop.f32.mrb[4].mxu1  ;;  %v785_v52 = vmax.f32 %v758_v42, 0.0 }
 0x103   : > { %v788_v48 = vmax.f32 %v761_v44, 0.0  ;;  %v560_v49 = vadd.f32 %v1111_v46, %v998_v24  ;;  %v551_v50 = vpop.f32.mrb[5].mxu1  ;;  %v1135_v51 = vpop.f32.mrb[4].mxu0 }
 0x104   : > { %v786_v53 = vmax.f32 %v759_v45, 0.0  ;;  %v552_v54 = vadd.f32 %v998_v24, %v551_v50  ;;  %v1112_v55 = vpop.f32.mrb[6].mxu1  ;;  %v743_v56 = vpop.f32.mrb[5].mxu0 }
 0x105   : > { %v1050_v57 = vpack.c.bf16 %v788_v48, %v787_v47  ;;  %v579_v58 = vadd.f32 %v1011_v26, %v560_v49  ;;  %v563_v59 = vadd.f32 %v1112_v55, %v998_v24  ;;  %v554_v60 = vpop.f32.mrb[7].mxu1  ;;  %v1136_v61 = vpop.f32.mrb[6].mxu0 }
 0x106   : > { %v1045_v62 = vpack.c.bf16 %v786_v53, %v785_v52  ;;  %v577_v63 = vadd.f32 %v1011_v26, %v552_v54  ;;  %v555_v0 = vadd.f32 %v998_v24, %v554_v60  ;;  %v746_v1 = vpop.f32.mrb[7].mxu0 }
 0x107   : > { %1062 = vst [vmem:[%s391_s30 + $0x8] sm:$0xff] %v1050_v57   ;;  %v764_v2 = vadd.f32 %v1135_v51, %v579_v58  ;;  %v580_v3 = vadd.f32 %v1011_v26, %v563_v59 }
 0x108   : > { %1046 = vst [vmem:[%s391_s30] sm:$0xff] %v1045_v62   ;;  %v762_v4 = vadd.f32 %v743_v56, %v577_v63  ;;  %v578_v5 = vadd.f32 %v1011_v26, %v555_v0 }
 0x109   : > { %v765_v6 = vadd.f32 %v1136_v61, %v580_v3  ;;  %v791_v8 = vmax.f32 %v764_v2, 0.0 }
 0x10a   : > { %v763_v7 = vadd.f32 %v746_v1, %v578_v5  ;;  %v789_v10 = vmax.f32 %v762_v4, 0.0 }
 0x10b   : > { %v792_v9 = vmax.f32 %v765_v6, 0.0 }
 0x10c   : > { %v790_v11 = vmax.f32 %v763_v7, 0.0 }
 0x10d   : > { %v1060_v12 = vpack.c.bf16 %v792_v9, %v791_v8 }
 0x10e   : > { %v1055_v13 = vpack.c.bf16 %v790_v11, %v789_v10 }
 0x10f   : > { %1064 = vst [vmem:[%s391_s30 + $0x18] sm:$0xff] %v1060_v12  }
 0x110   : > { %1063 = vst [vmem:[%s391_s30 + $0x10] sm:$0xff] %v1055_v13  }
 0x111 PF: > { %s16_s23 = sadd.s32 1, %s1231_s23   ;;  %s1382_s21 = smov %s1227_s22 }
 0x112   : > { %p13_p5 = scmp.ge.s32.totalorder %s16_s23, 4   ;;  %s1383_s22 = smov %s1385_s24 }
 0x114   :  { %15 = sbr.rel (!%p13_p5) target bundleno = 2 (0x2), region = 97 }

</bundles_post_ra>
